<compile_context>
chip_gen: v7x
topology: tpu7x:2x2x1
jax: 0.10.0
libtpu: 0.0.40
codegen_flags: <defaults>
</compile_context>

<pallas_src>
from types import SimpleNamespace

import jax
import jax.numpy as jnp
from jax.experimental import pallas as pl
from jax.experimental.pallas import tpu as pltpu

VMEM = pltpu.MemorySpace.VMEM
SMEM = pltpu.MemorySpace.SMEM

NODE_BUCKETS = (32, 64, 128, 256)
EDGE_BUCKETS = (128, 256, 512, 1024)


def _round_up(x, m):
    return ((x + m - 1) // m) * m


def _bucket(x, buckets):
    for b in buckets:
        if x <= b:
            return b
    return _round_up(x, buckets[-1])


# --------------------------------------------------------------------------------------
# Parameter packing: all weights in one (R, W) f32 buffer, 8-row-aligned blocks.
# --------------------------------------------------------------------------------------
def _pack_params(named_params):
    width = max(int(a.shape[1]) for _, a in named_params)
    blocks, layout, off = [], {}, 0
    for name, a in named_params:
        r, c = int(a.shape[0]), int(a.shape[1])
        rp = _round_up(r, 8)
        blk = jnp.zeros((rp, width), jnp.float32).at[:r, :c].set(a.astype(jnp.float32))
        blocks.append(blk)
        layout[name] = (off, r, c)
        off += rp
    return jnp.concatenate(blocks, axis=0), layout


def init_params(key, args):
    ks = jax.random.split(key, 19)
    s = 0.1
    emb = args.embedding_size
    f1, f2, f3 = args.filters_1, args.filters_2, args.filters_3
    k_t, bn = args.tensor_neurons, args.bottle_neck_neurons

    w_ntn = jax.random.normal(ks[12], (f3, f3, k_t), jnp.float32) * s      # W[i, a, k]
    w_block = jax.random.normal(ks[13], (k_t, 2 * f3), jnp.float32) * s
    ntn_bias = jax.random.normal(ks[14], (k_t, 1), jnp.float32) * s
    fc1_w = jax.random.normal(ks[15], (bn, k_t), jnp.float32) * s
    fc1_b = jax.random.normal(ks[16], (bn,), jnp.float32) * s
    sc_w = jax.random.normal(ks[17], (1, bn), jnp.float32) * s
    sc_b = jax.random.normal(ks[18], (1,), jnp.float32) * s

    named = [
        # SAGEConv 1..3:  out = L2_normalize((A@X)@Wl + X@Wr + b)   [+ReLU on layers 1,2]
        ("wl1", jax.random.normal(ks[0], (emb, f1), jnp.float32) * s),
        ("wr1", jax.random.normal(ks[1], (emb, f1), jnp.float32) * s),
        ("bl1", jax.random.normal(ks[2], (1, f1), jnp.float32) * s),
        ("wl2", jax.random.normal(ks[3], (f1, f2), jnp.float32) * s),
        ("wr2", jax.random.normal(ks[4], (f1, f2), jnp.float32) * s),
        ("bl2", jax.random.normal(ks[5], (1, f2), jnp.float32) * s),
        ("wl3", jax.random.normal(ks[6], (f2, f3), jnp.float32) * s),
        ("wr3", jax.random.normal(ks[7], (f2, f3), jnp.float32) * s),
        ("bl3", jax.random.normal(ks[8], (1, f3), jnp.float32) * s),
        # Attention module
        ("att_w", jax.random.normal(ks[9], (f3, f3), jnp.float32) * s),
        # Tensor network (row layout): bil = kron(e1,e2) @ w_flat, row i*F3+a == W[i,a,:]
        ("ntn_w_flat", w_ntn.reshape(f3 * f3, k_t)),
        ("ntn_wb1_t", jnp.transpose(w_block[:, :f3])),   # (F3, K)
        ("ntn_wb2_t", jnp.transpose(w_block[:, f3:])),   # (F3, K)
        ("ntn_bias", jnp.transpose(ntn_bias)),           # (1, K)
        # FC head (row layout)
        ("fc1_wt", jnp.transpose(fc1_w)),                # (K, B)
        ("fc1_b", fc1_b[None, :]),                       # (1, B)
        ("sc_wt", jnp.transpose(sc_w)),                  # (B, 1)
        ("sc_b", sc_b[None, :]),                         # (1, 1)
    ]
    return _pack_params(named)


# --------------------------------------------------------------------------------------
# The fully fused kernel:
#   in-kernel A_hat -> 3x SAGEConv (both graphs stacked) -> masked attention pooling
#   -> NTN bilinear + block term -> FC1 + ReLU -> sigmoid score.
# --------------------------------------------------------------------------------------
def _make_kernel(layout):
    f3 = layout["att_w"][2]
    f3_pow2 = (f3 & (f3 - 1)) == 0

    def kernel(sizes_ref, esrc_ref, edst_ref, x_ref, w_ref, o_ref):
        def getp(name):
            off, r, c = layout[name]
            return w_ref[off:off + r, 0:c]

        n_stack = x_ref.shape[0]          # 2 * n_pad (both graphs stacked)
        n_pad = n_stack // 2
        e_pad = esrc_ref.shape[0]
        n1 = sizes_ref[0]                 # true node counts (runtime scalars)
        n2 = sizes_ref[1]

        # ---- block-diagonal row-normalized adjacency from the padded edge lists.
        lane_ids = jax.lax.broadcasted_iota(jnp.int32, (e_pad, n_stack), 1)
        onehot_src = (esrc_ref[...] == lane_ids).astype(jnp.float32)       # (E, 2N)
        onehot_dst = (edst_ref[...] == lane_ids).astype(jnp.float32)       # (E, 2N)
        a_counts = jax.lax.dot_general(onehot_dst, onehot_src,
                                       (((0,), (0,)), ((), ())),
                                       preferred_element_type=jnp.float32)  # (2N, 2N)
        deg = jax.lax.dot_general(onehot_dst, jnp.ones((e_pad, 1), jnp.float32),
                                  (((0,), (0,)), ((), ())),
                                  preferred_element_type=jnp.float32)       # (2N, 1)
        a_hat = a_counts / jnp.maximum(deg, 1.0)

        # ---- per-graph membership mask: column g == 1.0 for real nodes of graph g.
        rr = jax.lax.broadcasted_iota(jnp.int32, (n_stack, 2), 0)
        cc = jax.lax.broadcasted_iota(jnp.int32, (n_stack, 2), 1)
        g1 = jnp.logical_and(cc == 0, rr < n1)
        g2 = jnp.logical_and(cc == 1, jnp.logical_and(rr >= n_pad, rr < n_pad + n2))
        gmask = jnp.logical_or(g1, g2).astype(jnp.float32)                  # (2N, 2)

        # ---- 3 fused SAGEConv(normalize=True) layers over both graphs at once.
        def sage(x, wl, wr, b, relu):
            agg = jnp.dot(a_hat, x, preferred_element_type=jnp.float32)
            out = (jnp.dot(agg, wl, preferred_element_type=jnp.float32)
                   + jnp.dot(x, wr, preferred_element_type=jnp.float32) + b)
            # F.normalize(out, p=2, dim=-1) == rsqrt(max(||x||^2, 1e-24)) scaling
            ss = jnp.sum(out * out, axis=1, keepdims=True)
            out = out * jax.lax.rsqrt(jnp.maximum(ss, 1e-24))
            return jnp.maximum(out, 0.0) if relu else out

        h = sage(x_ref[...], getp("wl1"), getp("wr1"), getp("bl1"), True)
        # TODO(synk): dropout is identity in eval mode (training=False), so it is omitted.
        h = sage(h, getp("wl2"), getp("wr2"), getp("bl2"), True)
        feat = sage(h, getp("wl3"), getp("wr3"), getp("bl3"), False)        # (2N, F3)

        # ---- attention pooling for both graphs (masked mean + sigmoid-gated sum).
        sums = jax.lax.dot_general(gmask, feat, (((0,), (0,)), ((), ())),
                                   preferred_element_type=jnp.float32)      # (2, F3)
        ridx = jax.lax.broadcasted_iota(jnp.int32, (2, 1), 0)
        inv_n = 1.0 / jnp.where(ridx == 0, n1, n2).astype(jnp.float32)      # (2, 1)
        ctx = jnp.dot(sums, getp("att_w"), preferred_element_type=jnp.float32) * inv_n
        tg = jnp.tanh(ctx)                                                  # (2, F3)
        s_all = jax.nn.sigmoid(
            jax.lax.dot_general(feat, tg, (((1,), (1,)), ((), ())),
                                preferred_element_type=jnp.float32))        # (2N, 2)
        rep = jax.lax.dot_general(gmask * s_all, feat, (((0,), (0,)), ((), ())),
                                  preferred_element_type=jnp.float32)       # (2, F3)
        p1 = rep[0:1, :]                                                    # (1, F3)
        p2 = rep[1:2, :]                                                    # (1, F3)

        # ---- NTN bilinear via in-kernel Kronecker selectors (no reshape/transpose).
        sel_r = jax.lax.broadcasted_iota(jnp.int32, (f3, f3 * f3), 0)
        sel_c = jax.lax.broadcasted_iota(jnp.int32, (f3, f3 * f3), 1)
        if f3_pow2:
            hi = jnp.right_shift(sel_c, f3.bit_length() - 1)
            lo = jnp.bitwise_and(sel_c, f3 - 1)
        else:
            hi = sel_c // f3
            lo = sel_c % f3
        s1 = (hi == sel_r).astype(jnp.float32)        # j -> p1[j // F3]
        s2 = (lo == sel_r).astype(jnp.float32)        # j -> p2[j %  F3]
        kron = (jnp.dot(p1, s1, preferred_element_type=jnp.float32)
                * jnp.dot(p2, s2, preferred_element_type=jnp.float32))      # (1, F3*F3)
        bil = jnp.dot(kron, getp("ntn_w_flat"), preferred_element_type=jnp.float32)
        blk = (jnp.dot(p1, getp("ntn_wb1_t"), preferred_element_type=jnp.float32)
               + jnp.dot(p2, getp("ntn_wb2_t"), preferred_element_type=jnp.float32))
        scores = jnp.maximum(bil + blk + getp("ntn_bias"), 0.0)             # (1, K)

        hid = jnp.maximum(
            jnp.dot(scores, getp("fc1_wt"), preferred_element_type=jnp.float32)
            + getp("fc1_b"), 0.0)                                           # (1, B)
        o_ref[...] = jax.nn.sigmoid(
            jnp.dot(hid, getp("sc_wt"), preferred_element_type=jnp.float32)
            + getp("sc_b"))                                                 # (1, 1)

    return kernel


def build_forward(layout):
    kernel = _make_kernel(layout)

    @jax.jit
    def forward(packed_params, sizes, edge_src, edge_dst, x):
        return pl.pallas_call(
            kernel,
            out_shape=jax.ShapeDtypeStruct((1, 1), jnp.float32),
            in_specs=[
                pl.BlockSpec(memory_space=SMEM),   # [n1, n2] scalar node counts
                pl.BlockSpec(memory_space=VMEM),   # edge src column (E_pad, 1) int32
                pl.BlockSpec(memory_space=VMEM),   # edge dst column (E_pad, 1) int32
                pl.BlockSpec(memory_space=VMEM),   # stacked node features (2N, emb)
                pl.BlockSpec(memory_space=VMEM),   # packed parameters (one DMA)
            ],
            out_specs=pl.BlockSpec(memory_space=VMEM),
        )(sizes, edge_src, edge_dst, x, packed_params)

    return forward


# --------------------------------------------------------------------------------------
# Host-side input prep: bucketed padding, edge offset/concat, NO scatter anywhere.
# --------------------------------------------------------------------------------------
def prepare_pair(edge_index_1, features_1, edge_index_2, features_2):
    n1, n2 = int(features_1.shape[0]), int(features_2.shape[0])
    e1, e2 = int(edge_index_1.shape[1]), int(edge_index_2.shape[1])
    n_pad = _bucket(max(n1, n2), NODE_BUCKETS)     # fixed buckets -> one compile per bucket
    e_pad = _bucket(e1 + e2, EDGE_BUCKETS)

    x = jnp.concatenate([
        jnp.pad(features_1.astype(jnp.float32), ((0, n_pad - n1), (0, 0))),
        jnp.pad(features_2.astype(jnp.float32), ((0, n_pad - n2), (0, 0)))], axis=0)
    src = jnp.concatenate([edge_index_1[0], edge_index_2[0] + n_pad]).astype(jnp.int32)
    dst = jnp.concatenate([edge_index_1[1], edge_index_2[1] + n_pad]).astype(jnp.int32)
    sentinel = 2 * n_pad                           # padded edges match no node column
    src = jnp.pad(src, (0, e_pad - (e1 + e2)), constant_values=sentinel)
    dst = jnp.pad(dst, (0, e_pad - (e1 + e2)), constant_values=sentinel)
    sizes = jnp.array([n1, n2], jnp.int32)
    return sizes, src[:, None], dst[:, None], x


if __name__ == "__main__":
    args = SimpleNamespace(
        embedding_size=32,
        filters_1=64,
        filters_2=32,
        filters_3=16,
        tensor_neurons=16,
        bottle_neck_neurons=16,
        bins=16,
        histogram=False,
        dropout=0.5,
    )

    key = jax.random.PRNGKey(0)
    k_param, k_f1, k_f2, k_e1s, k_e1d, k_e2s, k_e2d = jax.random.split(key, 7)

    n1, n2, e1, e2 = 32, 24, 64, 48
    features_1 = jax.random.normal(k_f1, (n1, args.embedding_size), jnp.float32)
    features_2 = jax.random.normal(k_f2, (n2, args.embedding_size), jnp.float32)
    edge_index_1 = jnp.stack([
        jax.random.randint(k_e1s, (e1,), 0, n1, jnp.int32),
        jax.random.randint(k_e1d, (e1,), 0, n1, jnp.int32)])
    edge_index_2 = jnp.stack([
        jax.random.randint(k_e2s, (e2,), 0, n2, jnp.int32),
        jax.random.randint(k_e2d, (e2,), 0, n2, jnp.int32)])

    packed_params, layout = init_params(k_param, args)
    forward = build_forward(layout)

    # TODO(synk): args.histogram branch (torch.histc) is disabled, matching the default config.
    # TODO(synk): batching many graph pairs per call would amortize launch cost further; the
    #             reference interface scores a single pair, so one fused call per pair is used.
    sizes, esrc, edst, x = prepare_pair(edge_index_1, features_1, edge_index_2, features_2)
    score = forward(packed_params, sizes, esrc, edst, x)
    jax.block_until_ready(score)
    assert score.shape == (1, 1)
    print("KERNEL_OK")
</pallas_src>

<mosaic_0001>
module attributes {stable_mosaic.version = 11 : i64} {
  func.func @kernel(%arg0: memref<2xi32, #tpu.memory_space<smem>>, %arg1: memref<128x1xi32, #tpu.memory_space<vmem>>, %arg2: memref<128x1xi32, #tpu.memory_space<vmem>>, %arg3: memref<64x32xf32, #tpu.memory_space<vmem>>, %arg4: memref<640x64xf32, #tpu.memory_space<vmem>>, %arg5: memref<1x1xf32, #tpu.memory_space<vmem>>) attributes {dimension_semantics = [], scalar_prefetch = 0 : i64, scratch_operands = 0 : i64, tpu.core_type = #tpu.core_type<tc>} {
    %c0 = arith.constant 0 : index
    %0 = memref.load %arg0[%c0] : memref<2xi32, #tpu.memory_space<smem>>
    %c1 = arith.constant 1 : index
    %1 = memref.load %arg0[%c1] : memref<2xi32, #tpu.memory_space<smem>>
    %2 = tpu.iota {dimensions = array<i32: 1>} : vector<128x64xi32>
    %c0_0 = arith.constant 0 : index
    %c0_1 = arith.constant 0 : index
    %3 = vector.load %arg1[%c0_0, %c0_1] : memref<128x1xi32, #tpu.memory_space<vmem>>, vector<128x1xi32>
    %4 = vector.broadcast %3 : vector<128x1xi32> to vector<128x64xi32>
    %5 = arith.cmpi eq, %4, %2 : vector<128x64xi32>
    %6 = arith.extui %5 : vector<128x64xi1> to vector<128x64xi32>
    %7 = arith.sitofp %6 : vector<128x64xi32> to vector<128x64xf32>
    %c0_2 = arith.constant 0 : index
    %c0_3 = arith.constant 0 : index
    %8 = vector.load %arg2[%c0_2, %c0_3] : memref<128x1xi32, #tpu.memory_space<vmem>>, vector<128x1xi32>
    %9 = vector.broadcast %8 : vector<128x1xi32> to vector<128x64xi32>
    %10 = arith.cmpi eq, %9, %2 : vector<128x64xi32>
    %11 = arith.extui %10 : vector<128x64xi1> to vector<128x64xi32>
    %12 = arith.sitofp %11 : vector<128x64xi32> to vector<128x64xf32>
    %cst = arith.constant dense<0.000000e+00> : vector<64x64xf32>
    %13 = tpu.matmul %12, %7, %cst {dimension_numbers = #tpu.dot_dimension_numbers<[0], [0], [1], [1], [0, 1, 1, 1], [], []>} : vector<128x64xf32>, vector<128x64xf32>, vector<64x64xf32> -> vector<64x64xf32>
    %cst_4 = arith.constant 1.000000e+00 : f32
    %14 = vector.broadcast %cst_4 : f32 to vector<128x1xf32>
    %cst_5 = arith.constant dense<0.000000e+00> : vector<64x1xf32>
    %15 = tpu.matmul %12, %14, %cst_5 {dimension_numbers = #tpu.dot_dimension_numbers<[0], [0], [1], [1], [0, 1, 1, 1], [], []>} : vector<128x64xf32>, vector<128x1xf32>, vector<64x1xf32> -> vector<64x1xf32>
    %cst_6 = arith.constant 1.000000e+00 : f32
    %16 = vector.broadcast %cst_6 : f32 to vector<64x1xf32>
    %17 = arith.maximumf %15, %16 : vector<64x1xf32>
    %18 = vector.broadcast %17 : vector<64x1xf32> to vector<64x64xf32>
    %19 = arith.divf %13, %18 : vector<64x64xf32>
    %20 = tpu.iota {dimensions = array<i32: 0>} : vector<64x2xi32>
    %21 = tpu.iota {dimensions = array<i32: 1>} : vector<64x2xi32>
    %c0_i32 = arith.constant 0 : i32
    %22 = vector.broadcast %c0_i32 : i32 to vector<64x2xi32>
    %23 = arith.cmpi eq, %21, %22 : vector<64x2xi32>
    %24 = vector.broadcast %0 : i32 to vector<64x2xi32>
    %25 = arith.cmpi slt, %20, %24 : vector<64x2xi32>
    %26 = arith.andi %23, %25 : vector<64x2xi1>
    %c1_i32 = arith.constant 1 : i32
    %27 = vector.broadcast %c1_i32 : i32 to vector<64x2xi32>
    %28 = arith.cmpi eq, %21, %27 : vector<64x2xi32>
    %c32_i32 = arith.constant 32 : i32
    %29 = vector.broadcast %c32_i32 : i32 to vector<64x2xi32>
    %30 = arith.cmpi sge, %20, %29 : vector<64x2xi32>
    %c32_i32_7 = arith.constant 32 : i32
    %31 = arith.addi %c32_i32_7, %1 : i32
    %32 = vector.broadcast %31 : i32 to vector<64x2xi32>
    %33 = arith.cmpi slt, %20, %32 : vector<64x2xi32>
    %34 = arith.andi %30, %33 : vector<64x2xi1>
    %35 = arith.andi %28, %34 : vector<64x2xi1>
    %36 = arith.ori %26, %35 : vector<64x2xi1>
    %37 = arith.extui %36 : vector<64x2xi1> to vector<64x2xi32>
    %38 = arith.sitofp %37 : vector<64x2xi32> to vector<64x2xf32>
    %c0_8 = arith.constant 0 : index
    %c0_9 = arith.constant 0 : index
    %39 = vector.load %arg3[%c0_8, %c0_9] : memref<64x32xf32, #tpu.memory_space<vmem>>, vector<64x32xf32>
    %c0_10 = arith.constant 0 : index
    %c0_11 = arith.constant 0 : index
    %40 = vector.load %arg4[%c0_10, %c0_11] : memref<640x64xf32, #tpu.memory_space<vmem>>, vector<32x64xf32>
    %c32 = arith.constant 32 : index
    %c0_12 = arith.constant 0 : index
    %41 = vector.load %arg4[%c32, %c0_12] : memref<640x64xf32, #tpu.memory_space<vmem>>, vector<32x64xf32>
    %c64 = arith.constant 64 : index
    %c0_13 = arith.constant 0 : index
    %42 = vector.load %arg4[%c64, %c0_13] : memref<640x64xf32, #tpu.memory_space<vmem>>, vector<1x64xf32>
    %cst_14 = arith.constant dense<0.000000e+00> : vector<64x32xf32>
    %43 = tpu.matmul %19, %39, %cst_14 {dimension_numbers = #tpu.dot_dimension_numbers<[1], [0], [0], [1], [0, 0, 1, 1], [], []>} : vector<64x64xf32>, vector<64x32xf32>, vector<64x32xf32> -> vector<64x32xf32>
    %cst_15 = arith.constant dense<0.000000e+00> : vector<64x64xf32>
    %44 = tpu.matmul %43, %40, %cst_15 {dimension_numbers = #tpu.dot_dimension_numbers<[1], [0], [0], [1], [0, 0, 1, 1], [], []>} : vector<64x32xf32>, vector<32x64xf32>, vector<64x64xf32> -> vector<64x64xf32>
    %cst_16 = arith.constant dense<0.000000e+00> : vector<64x64xf32>
    %45 = tpu.matmul %39, %41, %cst_16 {dimension_numbers = #tpu.dot_dimension_numbers<[1], [0], [0], [1], [0, 0, 1, 1], [], []>} : vector<64x32xf32>, vector<32x64xf32>, vector<64x64xf32> -> vector<64x64xf32>
    %46 = arith.addf %44, %45 : vector<64x64xf32>
    %47 = vector.broadcast %42 : vector<1x64xf32> to vector<64x64xf32>
    %48 = arith.addf %46, %47 : vector<64x64xf32>
    %49 = arith.mulf %48, %48 : vector<64x64xf32>
    %cst_17 = arith.constant dense<0.000000e+00> : vector<64xf32>
    %50 = vector.multi_reduction <add>, %49, %cst_17 [1] : vector<64x64xf32> to vector<64xf32>
    %51 = vector.shape_cast %50 : vector<64xf32> to vector<64x1xf32>
    %cst_18 = arith.constant 1.000000e-24 : f32
    %52 = vector.broadcast %cst_18 : f32 to vector<64x1xf32>
    %53 = arith.maximumf %51, %52 : vector<64x1xf32>
    %54 = math.rsqrt %53 : vector<64x1xf32>
    %55 = vector.broadcast %54 : vector<64x1xf32> to vector<64x64xf32>
    %56 = arith.mulf %48, %55 : vector<64x64xf32>
    %cst_19 = arith.constant 0.000000e+00 : f32
    %57 = vector.broadcast %cst_19 : f32 to vector<64x64xf32>
    %58 = arith.maximumf %56, %57 : vector<64x64xf32>
    %c72 = arith.constant 72 : index
    %c0_20 = arith.constant 0 : index
    %59 = vector.load %arg4[%c72, %c0_20] : memref<640x64xf32, #tpu.memory_space<vmem>>, vector<64x32xf32>
    %c136 = arith.constant 136 : index
    %c0_21 = arith.constant 0 : index
    %60 = vector.load %arg4[%c136, %c0_21] : memref<640x64xf32, #tpu.memory_space<vmem>>, vector<64x32xf32>
    %c200 = arith.constant 200 : index
    %c0_22 = arith.constant 0 : index
    %61 = vector.load %arg4[%c200, %c0_22] : memref<640x64xf32, #tpu.memory_space<vmem>>, vector<1x32xf32>
    %cst_23 = arith.constant dense<0.000000e+00> : vector<64x64xf32>
    %62 = tpu.matmul %19, %58, %cst_23 {dimension_numbers = #tpu.dot_dimension_numbers<[1], [0], [0], [1], [0, 0, 1, 1], [], []>} : vector<64x64xf32>, vector<64x64xf32>, vector<64x64xf32> -> vector<64x64xf32>
    %cst_24 = arith.constant dense<0.000000e+00> : vector<64x32xf32>
    %63 = tpu.matmul %62, %59, %cst_24 {dimension_numbers = #tpu.dot_dimension_numbers<[1], [0], [0], [1], [0, 0, 1, 1], [], []>} : vector<64x64xf32>, vector<64x32xf32>, vector<64x32xf32> -> vector<64x32xf32>
    %cst_25 = arith.constant dense<0.000000e+00> : vector<64x32xf32>
    %64 = tpu.matmul %58, %60, %cst_25 {dimension_numbers = #tpu.dot_dimension_numbers<[1], [0], [0], [1], [0, 0, 1, 1], [], []>} : vector<64x64xf32>, vector<64x32xf32>, vector<64x32xf32> -> vector<64x32xf32>
    %65 = arith.addf %63, %64 : vector<64x32xf32>
    %66 = vector.broadcast %61 : vector<1x32xf32> to vector<64x32xf32>
    %67 = arith.addf %65, %66 : vector<64x32xf32>
    %68 = arith.mulf %67, %67 : vector<64x32xf32>
    %cst_26 = arith.constant dense<0.000000e+00> : vector<64xf32>
    %69 = vector.multi_reduction <add>, %68, %cst_26 [1] : vector<64x32xf32> to vector<64xf32>
    %70 = vector.shape_cast %69 : vector<64xf32> to vector<64x1xf32>
    %cst_27 = arith.constant 1.000000e-24 : f32
    %71 = vector.broadcast %cst_27 : f32 to vector<64x1xf32>
    %72 = arith.maximumf %70, %71 : vector<64x1xf32>
    %73 = math.rsqrt %72 : vector<64x1xf32>
    %74 = vector.broadcast %73 : vector<64x1xf32> to vector<64x32xf32>
    %75 = arith.mulf %67, %74 : vector<64x32xf32>
    %cst_28 = arith.constant 0.000000e+00 : f32
    %76 = vector.broadcast %cst_28 : f32 to vector<64x32xf32>
    %77 = arith.maximumf %75, %76 : vector<64x32xf32>
    %c208 = arith.constant 208 : index
    %c0_29 = arith.constant 0 : index
    %78 = vector.load %arg4[%c208, %c0_29] : memref<640x64xf32, #tpu.memory_space<vmem>>, vector<32x16xf32>
    %c240 = arith.constant 240 : index
    %c0_30 = arith.constant 0 : index
    %79 = vector.load %arg4[%c240, %c0_30] : memref<640x64xf32, #tpu.memory_space<vmem>>, vector<32x16xf32>
    %c272 = arith.constant 272 : index
    %c0_31 = arith.constant 0 : index
    %80 = vector.load %arg4[%c272, %c0_31] : memref<640x64xf32, #tpu.memory_space<vmem>>, vector<1x16xf32>
    %cst_32 = arith.constant dense<0.000000e+00> : vector<64x32xf32>
    %81 = tpu.matmul %19, %77, %cst_32 {dimension_numbers = #tpu.dot_dimension_numbers<[1], [0], [0], [1], [0, 0, 1, 1], [], []>} : vector<64x64xf32>, vector<64x32xf32>, vector<64x32xf32> -> vector<64x32xf32>
    %cst_33 = arith.constant dense<0.000000e+00> : vector<64x16xf32>
    %82 = tpu.matmul %81, %78, %cst_33 {dimension_numbers = #tpu.dot_dimension_numbers<[1], [0], [0], [1], [0, 0, 1, 1], [], []>} : vector<64x32xf32>, vector<32x16xf32>, vector<64x16xf32> -> vector<64x16xf32>
    %cst_34 = arith.constant dense<0.000000e+00> : vector<64x16xf32>
    %83 = tpu.matmul %77, %79, %cst_34 {dimension_numbers = #tpu.dot_dimension_numbers<[1], [0], [0], [1], [0, 0, 1, 1], [], []>} : vector<64x32xf32>, vector<32x16xf32>, vector<64x16xf32> -> vector<64x16xf32>
    %84 = arith.addf %82, %83 : vector<64x16xf32>
    %85 = vector.broadcast %80 : vector<1x16xf32> to vector<64x16xf32>
    %86 = arith.addf %84, %85 : vector<64x16xf32>
    %87 = arith.mulf %86, %86 : vector<64x16xf32>
    %cst_35 = arith.constant dense<0.000000e+00> : vector<64xf32>
    %88 = vector.multi_reduction <add>, %87, %cst_35 [1] : vector<64x16xf32> to vector<64xf32>
    %89 = vector.shape_cast %88 : vector<64xf32> to vector<64x1xf32>
    %cst_36 = arith.constant 1.000000e-24 : f32
    %90 = vector.broadcast %cst_36 : f32 to vector<64x1xf32>
    %91 = arith.maximumf %89, %90 : vector<64x1xf32>
    %92 = math.rsqrt %91 : vector<64x1xf32>
    %93 = vector.broadcast %92 : vector<64x1xf32> to vector<64x16xf32>
    %94 = arith.mulf %86, %93 : vector<64x16xf32>
    %cst_37 = arith.constant dense<0.000000e+00> : vector<2x16xf32>
    %95 = tpu.matmul %38, %94, %cst_37 {dimension_numbers = #tpu.dot_dimension_numbers<[0], [0], [1], [1], [0, 1, 1, 1], [], []>} : vector<64x2xf32>, vector<64x16xf32>, vector<2x16xf32> -> vector<2x16xf32>
    %96 = tpu.iota {dimensions = array<i32: 0>} : vector<2x1xi32>
    %c0_i32_38 = arith.constant 0 : i32
    %97 = vector.broadcast %c0_i32_38 : i32 to vector<2x1xi32>
    %98 = arith.cmpi eq, %96, %97 : vector<2x1xi32>
    %99 = vector.broadcast %0 : i32 to vector<2x1xi32>
    %100 = vector.broadcast %1 : i32 to vector<2x1xi32>
    %101 = arith.select %98, %99, %100 : vector<2x1xi1>, vector<2x1xi32>
    %102 = arith.sitofp %101 : vector<2x1xi32> to vector<2x1xf32>
    %cst_39 = arith.constant 1.000000e+00 : f32
    %103 = vector.broadcast %cst_39 : f32 to vector<2x1xf32>
    %104 = arith.divf %103, %102 : vector<2x1xf32>
    %c280 = arith.constant 280 : index
    %c0_40 = arith.constant 0 : index
    %105 = vector.load %arg4[%c280, %c0_40] : memref<640x64xf32, #tpu.memory_space<vmem>>, vector<16x16xf32>
    %cst_41 = arith.constant dense<0.000000e+00> : vector<2x16xf32>
    %106 = tpu.matmul %95, %105, %cst_41 {dimension_numbers = #tpu.dot_dimension_numbers<[1], [0], [0], [1], [0, 0, 1, 1], [], []>} : vector<2x16xf32>, vector<16x16xf32>, vector<2x16xf32> -> vector<2x16xf32>
    %107 = vector.broadcast %104 : vector<2x1xf32> to vector<2x16xf32>
    %108 = arith.mulf %106, %107 : vector<2x16xf32>
    %109 = math.tanh %108 : vector<2x16xf32>
    %cst_42 = arith.constant dense<0.000000e+00> : vector<64x2xf32>
    %110 = tpu.matmul %94, %109, %cst_42 {dimension_numbers = #tpu.dot_dimension_numbers<[1], [1], [0], [0], [0, 0, 1, 0], [], []>} : vector<64x16xf32>, vector<2x16xf32>, vector<64x2xf32> -> vector<64x2xf32>
    %111 = arith.negf %110 : vector<64x2xf32>
    %112 = math.exp %111 : vector<64x2xf32>
    %cst_43 = arith.constant 1.000000e+00 : f32
    %113 = vector.broadcast %cst_43 : f32 to vector<64x2xf32>
    %114 = arith.addf %113, %112 : vector<64x2xf32>
    %115 = arith.divf %113, %114 : vector<64x2xf32>
    %116 = arith.mulf %38, %115 : vector<64x2xf32>
    %cst_44 = arith.constant dense<0.000000e+00> : vector<2x16xf32>
    %117 = tpu.matmul %116, %94, %cst_44 {dimension_numbers = #tpu.dot_dimension_numbers<[0], [0], [1], [1], [0, 1, 1, 1], [], []>} : vector<64x2xf32>, vector<64x16xf32>, vector<2x16xf32> -> vector<2x16xf32>
    %118 = vector.extract_strided_slice %117 {offsets = [0, 0], sizes = [1, 16], strides = [1, 1]} : vector<2x16xf32> to vector<1x16xf32>
    %119 = vector.extract_strided_slice %117 {offsets = [1, 0], sizes = [1, 16], strides = [1, 1]} : vector<2x16xf32> to vector<1x16xf32>
    %120 = tpu.iota {dimensions = array<i32: 0>} : vector<16x256xi32>
    %121 = tpu.iota {dimensions = array<i32: 1>} : vector<16x256xi32>
    %c4_i32 = arith.constant 4 : i32
    %122 = vector.broadcast %c4_i32 : i32 to vector<16x256xi32>
    %123 = arith.shrsi %121, %122 : vector<16x256xi32>
    %c15_i32 = arith.constant 15 : i32
    %124 = vector.broadcast %c15_i32 : i32 to vector<16x256xi32>
    %125 = arith.andi %121, %124 : vector<16x256xi32>
    %126 = arith.cmpi eq, %123, %120 : vector<16x256xi32>
    %127 = arith.extui %126 : vector<16x256xi1> to vector<16x256xi32>
    %128 = arith.sitofp %127 : vector<16x256xi32> to vector<16x256xf32>
    %129 = arith.cmpi eq, %125, %120 : vector<16x256xi32>
    %130 = arith.extui %129 : vector<16x256xi1> to vector<16x256xi32>
    %131 = arith.sitofp %130 : vector<16x256xi32> to vector<16x256xf32>
    %cst_45 = arith.constant dense<0.000000e+00> : vector<1x256xf32>
    %132 = tpu.matmul %118, %128, %cst_45 {dimension_numbers = #tpu.dot_dimension_numbers<[1], [0], [0], [1], [0, 0, 1, 1], [], []>} : vector<1x16xf32>, vector<16x256xf32>, vector<1x256xf32> -> vector<1x256xf32>
    %cst_46 = arith.constant dense<0.000000e+00> : vector<1x256xf32>
    %133 = tpu.matmul %119, %131, %cst_46 {dimension_numbers = #tpu.dot_dimension_numbers<[1], [0], [0], [1], [0, 0, 1, 1], [], []>} : vector<1x16xf32>, vector<16x256xf32>, vector<1x256xf32> -> vector<1x256xf32>
    %134 = arith.mulf %132, %133 : vector<1x256xf32>
    %c296 = arith.constant 296 : index
    %c0_47 = arith.constant 0 : index
    %135 = vector.load %arg4[%c296, %c0_47] : memref<640x64xf32, #tpu.memory_space<vmem>>, vector<256x16xf32>
    %cst_48 = arith.constant dense<0.000000e+00> : vector<1x16xf32>
    %136 = tpu.matmul %134, %135, %cst_48 {dimension_numbers = #tpu.dot_dimension_numbers<[1], [0], [0], [1], [0, 0, 1, 1], [], []>} : vector<1x256xf32>, vector<256x16xf32>, vector<1x16xf32> -> vector<1x16xf32>
    %c552 = arith.constant 552 : index
    %c0_49 = arith.constant 0 : index
    %137 = vector.load %arg4[%c552, %c0_49] : memref<640x64xf32, #tpu.memory_space<vmem>>, vector<16x16xf32>
    %cst_50 = arith.constant dense<0.000000e+00> : vector<1x16xf32>
    %138 = tpu.matmul %118, %137, %cst_50 {dimension_numbers = #tpu.dot_dimension_numbers<[1], [0], [0], [1], [0, 0, 1, 1], [], []>} : vector<1x16xf32>, vector<16x16xf32>, vector<1x16xf32> -> vector<1x16xf32>
    %c568 = arith.constant 568 : index
    %c0_51 = arith.constant 0 : index
    %139 = vector.load %arg4[%c568, %c0_51] : memref<640x64xf32, #tpu.memory_space<vmem>>, vector<16x16xf32>
    %cst_52 = arith.constant dense<0.000000e+00> : vector<1x16xf32>
    %140 = tpu.matmul %119, %139, %cst_52 {dimension_numbers = #tpu.dot_dimension_numbers<[1], [0], [0], [1], [0, 0, 1, 1], [], []>} : vector<1x16xf32>, vector<16x16xf32>, vector<1x16xf32> -> vector<1x16xf32>
    %141 = arith.addf %138, %140 : vector<1x16xf32>
    %142 = arith.addf %136, %141 : vector<1x16xf32>
    %c584 = arith.constant 584 : index
    %c0_53 = arith.constant 0 : index
    %143 = vector.load %arg4[%c584, %c0_53] : memref<640x64xf32, #tpu.memory_space<vmem>>, vector<1x16xf32>
    %144 = arith.addf %142, %143 : vector<1x16xf32>
    %cst_54 = arith.constant 0.000000e+00 : f32
    %145 = vector.broadcast %cst_54 : f32 to vector<1x16xf32>
    %146 = arith.maximumf %144, %145 : vector<1x16xf32>
    %c592 = arith.constant 592 : index
    %c0_55 = arith.constant 0 : index
    %147 = vector.load %arg4[%c592, %c0_55] : memref<640x64xf32, #tpu.memory_space<vmem>>, vector<16x16xf32>
    %cst_56 = arith.constant dense<0.000000e+00> : vector<1x16xf32>
    %148 = tpu.matmul %146, %147, %cst_56 {dimension_numbers = #tpu.dot_dimension_numbers<[1], [0], [0], [1], [0, 0, 1, 1], [], []>} : vector<1x16xf32>, vector<16x16xf32>, vector<1x16xf32> -> vector<1x16xf32>
    %c608 = arith.constant 608 : index
    %c0_57 = arith.constant 0 : index
    %149 = vector.load %arg4[%c608, %c0_57] : memref<640x64xf32, #tpu.memory_space<vmem>>, vector<1x16xf32>
    %150 = arith.addf %148, %149 : vector<1x16xf32>
    %cst_58 = arith.constant 0.000000e+00 : f32
    %151 = vector.broadcast %cst_58 : f32 to vector<1x16xf32>
    %152 = arith.maximumf %150, %151 : vector<1x16xf32>
    %c616 = arith.constant 616 : index
    %c0_59 = arith.constant 0 : index
    %153 = vector.load %arg4[%c616, %c0_59] : memref<640x64xf32, #tpu.memory_space<vmem>>, vector<16x1xf32>
    %cst_60 = arith.constant dense<0.000000e+00> : vector<1x1xf32>
    %154 = tpu.matmul %152, %153, %cst_60 {dimension_numbers = #tpu.dot_dimension_numbers<[1], [0], [0], [1], [0, 0, 1, 1], [], []>} : vector<1x16xf32>, vector<16x1xf32>, vector<1x1xf32> -> vector<1x1xf32>
    %c632 = arith.constant 632 : index
    %c0_61 = arith.constant 0 : index
    %155 = vector.load %arg4[%c632, %c0_61] : memref<640x64xf32, #tpu.memory_space<vmem>>, vector<1x1xf32>
    %156 = arith.addf %154, %155 : vector<1x1xf32>
    %157 = arith.negf %156 : vector<1x1xf32>
    %158 = math.exp %157 : vector<1x1xf32>
    %cst_62 = arith.constant 1.000000e+00 : f32
    %159 = vector.broadcast %cst_62 : f32 to vector<1x1xf32>
    %160 = arith.addf %159, %158 : vector<1x1xf32>
    %161 = arith.divf %159, %160 : vector<1x1xf32>
    %c0_63 = arith.constant 0 : index
    %c0_64 = arith.constant 0 : index
    %162 = vector.load %arg5[%c0_63, %c0_64] : memref<1x1xf32, #tpu.memory_space<vmem>>, vector<1x1xf32>
    tpu.vector_store %arg5[%c0_63, %c0_64], %161 {strides = array<i32>} : memref<1x1xf32, #tpu.memory_space<vmem>>, vector<1x1xf32>,
    return
  }
}

</mosaic_0001>

<bundles_post_ra>
// kernel: forward.1
= control target key start
LH: loop header
LB: loop body
LE: loop exit
PB: predicated region body
PF: predicated region fallthrough
CT: control target
= control target key end

     0   :  { %10 = vsyncpa [#allocation4], 0  ;;  %s5348_s0 = inlined_call_operand.vmem [shape: s32[2], index: 0, kind: input, shape index: {}]   ;;  %s5349_s1 = inlined_call_operand.vmem [shape: s32[128,1], index: 1, kind: input, shape index: {}]   ;;  %s5350_s2 = inlined_call_operand.vmem [shape: s32[128,1], index: 2, kind: input, shape index: {}]   ;;  %s5351_s3 = inlined_call_operand.vmem [shape: f32[64,32], index: 3, kind: input, shape index: {}]   ;;  %s5352_s4 = inlined_call_operand.vmem [shape: f32[640,64], index: 4, kind: input, shape index: {}]   ;;  %s5353_s5 = inlined_call_operand.hbm [shape: f32[1,1], index: 5, kind: output, shape index: {}]  }
   0x1   :  { %11 = vsyncpa [#allocation3], 0  ;;  %s18_s20 = sshll.u32 %s5348_s0, 4  ;;  %s19_s20 = int_to_ptr.vmem [resolvable:$true] %s18_s20 }
   0x2   :  { %s4325_s21 = scalar_lea.vmem %s19_s20, 16  ;;  %p4330_p1 = scmp.lt.s32.totalorder %s19_s20, %s19_s20 }
   0x3   :  { %p4326_p0 = scmp.ne.s32.totalorder %s19_s20, %s4325_s21  ;;  %p4331_p2 = scmp.lt.s32.totalorder %s4325_s21, %s4325_s21 }
   0x5   :  { %p4332_p3 = por %p4331_p2, %p4330_p1 }
   0x7   :  { %p4333_p4 = pnand %p4332_p3, %p4326_p0 }
   0x9   :  { %4336 = shalt.err (!%p4333_p4)
}
   0xa   :  { %s4363_s22 = smov [#allocation2]  }
   0xb   :  { %21 = dma.vmem_to_smem %s19_s20, 16, %s4363_s22, [#allocation4]  }
   0xc   :  { %4359 = dma.done.wait [#allocation4], 16  }
   0xd   :  { %4360 = vsyncadd [#allocation4], 4294967280 }
   0xe   :  { %33 = sfence }
   0xf   :  { %v152_v0 = vld [vmem:[%s5350_s2 + $0x10] sm:$0xff]  ;;  %v150_v1 = vld [vmem:[%s5350_s2] sm:$0xff]  ;;  %v4364_v2 = vmov 0   ;;  %v153_v3 = vld [vmem:[%s5350_s2 + $0x18] sm:$0xff]  ;;  %v4365_v20 = vmov 1.0|1.0   ;;  %v36_v34 = vlaneseq }
  0x10   :  { %4220 = vset.pattern.permute.xlu1 %v4364_v2  ;;  %4219 = vset.pattern.permute.xlu0 %v4364_v2  ;;  %v151_v4 = vld [vmem:[%s5350_s2 + $0x8] sm:$0xff]  ;;  %v154_v6 = vld [vmem:[%s5350_s2 + $0x20] sm:$0xff]  ;;  %v157_v7 = vld [vmem:[%s5350_s2 + $0x38] sm:$0xff]  ;;  %v4366_v38 = vmov 0.0   ;;  %s34_s7 = sld [smem:[#allocation2]]  ;;  %s4369_s11 = smov [#allocation5]  }
  0x11   :  { %173 = vperm.xlu1 %4220, %v152_v0   ;;  %167 = vperm.xlu0 %4219, %v150_v1   ;;  %v155_v5 = vld [vmem:[%s5350_s2 + $0x28] sm:$0xff]  ;;  %v156_v8 = vld [vmem:[%s5350_s2 + $0x30] sm:$0xff]  ;;  %v158_v10 = vld [vmem:[%s5350_s2 + $0x40] sm:$0xff]  ;;  %v4516_v35 = vand.u32 127, %v36_v34  ;;  %s3109_s12 = sshll.u32 %s4369_s11, 4  ;;  %s3110_s12 = int_to_ptr.vmem [resolvable:$true] %s3109_s12 }
  0x12   :  { %v159_v9 = vld [vmem:[%s5350_s2 + $0x48] sm:$0xff]  ;;  %v161_v11 = vld [vmem:[%s5350_s2 + $0x58] sm:$0xff]  ;;  %v160_v12 = vld [vmem:[%s5350_s2 + $0x50] sm:$0xff]  ;;  %3973 = vmatprep.subr.bf16.mxu1 %v4365_v20  ;;  %s4337_s13 = scalar_lea.vmem %s3110_s12, 16  ;;  %s4341_s14 = scalar_lea.vmem %s3110_s12, 32 }
  0x13   :  { %v163_v13 = vld [vmem:[%s5350_s2 + $0x68] sm:$0xff]  ;;  %v162_v14 = vld [vmem:[%s5350_s2 + $0x60] sm:$0xff]  ;;  %v165_v15 = vld [vmem:[%s5350_s2 + $0x78] sm:$0xff]  ;;  %3974 = vmatpush3.bf16.msra.mxu1 %v4365_v20  ;;  %p4338_p5 = scmp.ne.s32.totalorder %s3110_s12, %s4337_s13  ;;  %p4342_p6 = scmp.lt.s32.totalorder %s3110_s12, %s3110_s12 }
  0x14   :  { %v164_v16 = vld [vmem:[%s5350_s2 + $0x70] sm:$0xff]  ;;  %v38_v17 = vld [vmem:[%s5349_s1] sm:$0xff]  ;;  %v39_v18 = vld [vmem:[%s5349_s1 + $0x8] sm:$0xff]  ;;  %3975 = vmatprep.subr.bf16.mxu1 %v4365_v20  ;;  %p4343_p7 = scmp.lt.s32.totalorder %s4341_s14, %s4337_s13 }
  0x15   :  { %176 = vperm.xlu1 %4220, %v153_v3   ;;  %170 = vperm.xlu0 %4219, %v151_v4   ;;  %v40_v19 = vld [vmem:[%s5349_s1 + $0x10] sm:$0xff]  ;;  %v41_v21 = vld [vmem:[%s5349_s1 + $0x18] sm:$0xff]  ;;  %v42_v22 = vld [vmem:[%s5349_s1 + $0x20] sm:$0xff] }
  0x16   :  { %v43_v23 = vld [vmem:[%s5349_s1 + $0x28] sm:$0xff]  ;;  %v44_v24 = vld [vmem:[%s5349_s1 + $0x30] sm:$0xff]  ;;  %v45_v25 = vld [vmem:[%s5349_s1 + $0x38] sm:$0xff]  ;;  %p4344_p8 = por %p4343_p7, %p4342_p6 }
  0x17   :  { %3976 = vmatpush3.bf16.msra.mxu1 %v4365_v20  ;;  %v46_v26 = vld [vmem:[%s5349_s1 + $0x40] sm:$0xff]  ;;  %v47_v27 = vld [vmem:[%s5349_s1 + $0x48] sm:$0xff]  ;;  %v48_v28 = vld [vmem:[%s5349_s1 + $0x50] sm:$0xff] }
  0x18   :  { %3977 = vmatprep.subr.bf16.mxu1 %v4365_v20  ;;  %v49_v29 = vld [vmem:[%s5349_s1 + $0x58] sm:$0xff]  ;;  %v50_v30 = vld [vmem:[%s5349_s1 + $0x60] sm:$0xff]  ;;  %v51_v31 = vld [vmem:[%s5349_s1 + $0x68] sm:$0xff]  ;;  %p4345_p9 = pnand %p4344_p8, %p4338_p5 }
  0x19   :  { %182 = vperm.xlu1 %4220, %v155_v5   ;;  %179 = vperm.xlu0 %4219, %v154_v6   ;;  %v52_v32 = vld [vmem:[%s5349_s1 + $0x70] sm:$0xff]  ;;  %v53_v33 = vld [vmem:[%s5349_s1 + $0x78] sm:$0xff]  ;;  %s5027_s1 = sld [smem:[#allocation2 + $0x1]] }
  0x1b   :  { %3978 = vmatpush3.bf16.msra.mxu1 %v4365_v20 }
  0x1c   :  { %3979 = vmatprep.subr.bf16.mxu1 %v4365_v20 }
  0x1d   :  { %188 = vperm.xlu1 %4220, %v157_v7   ;;  %185 = vperm.xlu0 %4219, %v156_v8  }
  0x1f   :  { %3980 = vmatpush3.bf16.msra.mxu1 %v4365_v20  ;;  %s604_s8 = sadd.s32 32, %s5027_s1 }
  0x20   :  { %3981 = vmatprep.subr.bf16.mxu1 %v4365_v20 }
  0x21   :  { %194 = vperm.xlu1 %4220, %v159_v9   ;;  %191 = vperm.xlu0 %4219, %v158_v10  }
  0x23   :  { %3982 = vmatpush3.bf16.msra.mxu1 %v4365_v20 }
  0x24   :  { %3983 = vmatprep.subr.bf16.mxu1 %v4365_v20 }
  0x25   :  { %200 = vperm.xlu1 %4220, %v161_v11   ;;  %197 = vperm.xlu0 %4219, %v160_v12  }
  0x27   :  { %3984 = vmatpush3.bf16.msra.mxu1 %v4365_v20 }
  0x28   :  { %3985 = vmatprep.subr.bf16.mxu1 %v4365_v20 }
  0x29   :  { %206 = vperm.xlu1 %4220, %v163_v13   ;;  %203 = vperm.xlu0 %4219, %v162_v14  }
  0x2b   :  { %3986 = vmatpush3.bf16.msra.mxu1 %v4365_v20 }
  0x2c   :  { %3987 = vmatprep.subr.bf16.mxu1 %v4365_v20 }
  0x2d   :  { %212 = vperm.xlu1 %4220, %v165_v15   ;;  %209 = vperm.xlu0 %4219, %v164_v16  }
  0x2f   :  { %3988 = vmatpush3.bf16.msra.mxu1 %v4365_v20 }
  0x31   :  { %55 = vperm.xlu1 %4220, %v38_v17  }
  0x35   :  { %58 = vperm.xlu1 %4220, %v39_v18  }
  0x39   :  { %61 = vperm.xlu1 %4220, %v40_v19  }
  0x3d   :  { %64 = vperm.xlu1 %4220, %v41_v21  }
  0x41   :  { %67 = vperm.xlu1 %4220, %v42_v22  }
  0x45   :  { %70 = vperm.xlu1 %4220, %v43_v23  }
  0x49   :  { %73 = vperm.xlu1 %4220, %v44_v24  }
  0x4d   :  { %76 = vperm.xlu1 %4220, %v45_v25  }
  0x51   :  { %79 = vperm.xlu1 %4220, %v46_v26  }
  0x55   :  { %82 = vperm.xlu1 %4220, %v47_v27  }
  0x59   :  { %85 = vperm.xlu1 %4220, %v48_v28  }
  0x5d   :  { %88 = vperm.xlu1 %4220, %v49_v29  }
  0x61   :  { %91 = vperm.xlu1 %4220, %v50_v30  }
  0x65   :  { %94 = vperm.xlu1 %4220, %v51_v31  }
  0x69   :  { %97 = vperm.xlu1 %4220, %v52_v32  }
  0x6d   :  { %100 = vperm.xlu1 %4220, %v53_v33  }
  0x90   :  { %v174_v36 = vpop.permute.xlu1 %173  ;;  %v168_v37 = vpop.permute.xlu0 %167 }
  0x91   :  { %vm214_vm0 = vcmp.eq.s32.totalorder %v168_v37, %v4516_v35  ;;  %vm216_vm1 = vcmp.eq.s32.totalorder %v174_v36, %v4516_v35  ;;  %v4589_v37 = vld [vmem:[%s5351_s3] sm:$0xff] }
  0x92   :  { %v3135_v39 = vsel %vm214_vm0, 1.0, %v4366_v38  ;;  %v3137_v43 = vsel %vm216_vm1, 1.0, %v4366_v38 }
  0x93   :  { %262 = vxpose.xlu0.b32.start [1/16] (narrow) %v3135_v39, 64  ;;  %v4594_v39 = vld [vmem:[%s5351_s3 + $0x8] sm:$0xff] }
  0x94   :  { %v177_v40 = vpop.permute.xlu1 %176  ;;  %v171_v41 = vpop.permute.xlu0 %170 }
  0x95   :  { %vm215_vm2 = vcmp.eq.s32.totalorder %v171_v41, %v4516_v35  ;;  %vm217_vm3 = vcmp.eq.s32.totalorder %v177_v40, %v4516_v35  ;;  %v3989_v40 = vpack.c.bf16 %v4594_v39, %v4589_v37 }
  0x96   :  { %v3136_v42 = vsel %vm215_vm2, 1.0, %v4366_v38  ;;  %v3138_v47 = vsel %vm217_vm3, 1.0, %v4366_v38 }
  0x97   :  { %263 = vxpose.xlu0.b32.cont [2/16] (narrow) %v3136_v42, 64  ;;  %4180 = vmatprep.subr.bf16.mxu1 %v3989_v40  ;;  %v4601_v42 = vld [vmem:[%s5351_s3 + $0x10] sm:$0xff] }
  0x98   :  { %v183_v44 = vpop.permute.xlu1 %182  ;;  %v180_v45 = vpop.permute.xlu0 %179 }
  0x99   :  { %vm218_vm4 = vcmp.eq.s32.totalorder %v180_v45, %v4516_v35  ;;  %vm219_vm5 = vcmp.eq.s32.totalorder %v183_v44, %v4516_v35 }
  0x9a   :  { %v3139_v49 = vsel %vm218_vm4, 1.0, %v4366_v38  ;;  %v3140_v52 = vsel %vm219_vm5, 1.0, %v4366_v38 }
  0x9b   :  { %264 = vxpose.xlu0.b32.cont [3/16] (narrow) %v3137_v43, 64  ;;  %v4606_v43 = vld [vmem:[%s5351_s3 + $0x18] sm:$0xff] }
  0x9c   :  { %v189_v46 = vpop.permute.xlu1 %188  ;;  %v186_v50 = vpop.permute.xlu0 %185  ;;  %v3993_v44 = vpack.c.bf16 %v4606_v43, %v4601_v42 }
  0x9d   :  { %vm220_vm6 = vcmp.eq.s32.totalorder %v186_v50, %v4516_v35  ;;  %vm221_vm7 = vcmp.eq.s32.totalorder %v189_v46, %v4516_v35  ;;  %v4617_v50 = vld [vmem:[%s5351_s3 + $0x20] sm:$0xff] }
  0x9e   :  { %v3141_v54 = vsel %vm220_vm6, 1.0, %v4366_v38  ;;  %v3142_v57 = vsel %vm221_vm7, 1.0, %v4366_v38 }
  0x9f   :  { %265 = vxpose.xlu0.b32.cont [4/16] (narrow) %v3138_v47, 64 }
  0xa0   :  { %v195_v48 = vpop.permute.xlu1 %194  ;;  %v192_v55 = vpop.permute.xlu0 %191 }
  0xa1   :  { %vm222_vm8 = vcmp.eq.s32.totalorder %v192_v55, %v4516_v35  ;;  %vm223_vm9 = vcmp.eq.s32.totalorder %v195_v48, %v4516_v35  ;;  %v4634_v55 = vld [vmem:[%s5351_s3 + $0x38] sm:$0xff] }
  0xa2   :  { %v3143_v59 = vsel %vm222_vm8, 1.0, %v4366_v38  ;;  %v3144_v62 = vsel %vm223_vm9, 1.0, %v4366_v38 }
  0xa3   :  { %266 = vxpose.xlu0.b32.cont [5/16] (narrow) %v3139_v49, 64 }
  0xa4   :  { %v201_v51 = vpop.permute.xlu1 %200  ;;  %v198_v60 = vpop.permute.xlu0 %197 }
  0xa5   :  { %vm224_vm13 = vcmp.eq.s32.totalorder %v198_v60, %v4516_v35  ;;  %vm225_vm14 = vcmp.eq.s32.totalorder %v201_v51, %v4516_v35  ;;  %v4622_v51 = vld [vmem:[%s5351_s3 + $0x28] sm:$0xff] }
  0xa6   :  { %v3145_v0 = vsel %vm224_vm13, 1.0, %v4366_v38  ;;  %v3146_v3 = vsel %vm225_vm14, 1.0, %v4366_v38 }
  0xa7   :  { %267 = vxpose.xlu0.b32.cont [6/16] (narrow) %v3140_v52, 64  ;;  %v3997_v52 = vpack.c.bf16 %v4622_v51, %v4617_v50 }
  0xa8   :  { %v207_v53 = vpop.permute.xlu1 %206  ;;  %v204_v1 = vpop.permute.xlu0 %203 }
  0xa9   :  { %vm226_vm2 = vcmp.eq.s32.totalorder %v204_v1, %v4516_v35  ;;  %vm227_vm3 = vcmp.eq.s32.totalorder %v207_v53, %v4516_v35 }
  0xaa   :  { %v3147_v5 = vsel %vm226_vm2, 1.0, %v4366_v38  ;;  %v3148_v8 = vsel %vm227_vm3, 1.0, %v4366_v38 }
  0xab   :  { %268 = vxpose.xlu0.b32.cont [7/16] (narrow) %v3141_v54, 64  ;;  %v4629_v54 = vld [vmem:[%s5351_s3 + $0x30] sm:$0xff] }
  0xac   :  { %v213_v56 = vpop.permute.xlu1 %212  ;;  %v210_v6 = vpop.permute.xlu0 %209 }
  0xad   :  { %vm228_vm7 = vcmp.eq.s32.totalorder %v210_v6, %v4516_v35  ;;  %vm229_vm8 = vcmp.eq.s32.totalorder %v213_v56, %v4516_v35  ;;  %v4001_v56 = vpack.c.bf16 %v4634_v55, %v4629_v54 }
  0xae   :  { %v3149_v10 = vsel %vm228_vm7, 1.0, %v4366_v38  ;;  %v3150_v12 = vsel %vm229_vm8, 1.0, %v4366_v38  ;;  %vm671_vm8 = vcmask 523264  }
  0xaf   :  { %269 = vxpose.xlu0.b32.cont [8/16] (narrow) %v3142_v57, 64 }
  0xb0   :  { %v56_v58 = vpop.permute.xlu1 %55 }
  0xb1   :  { %vm102_vm10 = vcmp.eq.s32.totalorder %v56_v58, %v4516_v35 }
  0xb3   :  { %270 = vxpose.xlu0.b32.cont [9/16] (narrow) %v3143_v59, 64 }
  0xb4   :  { %v59_v61 = vpop.permute.xlu1 %58 }
  0xb5   :  { %vm103_vm11 = vcmp.eq.s32.totalorder %v59_v61, %v4516_v35 }
  0xb6   :  { %vm3941_vm12 = vmpackc.low %vm103_vm11, %vm102_vm10 }
  0xb7   :  { %271 = vxpose.xlu0.b32.cont [10/16] (narrow) %v3144_v62, 64  ;;  %3942 = vmatprep.subr.msk.bf16.mxu0 %vm3941_vm12, %v4365_v20 }
  0xb8   :  { %v62_v63 = vpop.permute.xlu1 %61  ;;  %3944 = vmatpush3.bf16.msk.msra.mxu0 %vm3941_vm12, %v4365_v20 }
  0xb9   :  { %vm104_vm15 = vcmp.eq.s32.totalorder %v62_v63, %v4516_v35  ;;  %v666_v63 = vld [vmem:[%s5352_s4 + $0x20] sm:$0xff] }
  0xbb   :  { %272 = vxpose.xlu0.b32.cont [11/16] (narrow) %v3145_v0, 64  ;;  %v667_v0 = vld [vmem:[%s5352_s4 + $0x28] sm:$0xff] }
  0xbc   :  { %v65_v2 = vpop.permute.xlu1 %64  ;;  %v4005_v1 = vpack.c.bf16 %v667_v0, %v666_v63 }
  0xbd   :  { %vm105_vm0 = vcmp.eq.s32.totalorder %v65_v2, %v4516_v35 }
  0xbe   :  { %vm3945_vm1 = vmpackc.low %vm105_vm0, %vm104_vm15 }
  0xbf   :  { %273 = vxpose.xlu0.b32.cont [12/16] (narrow) %v3146_v3, 64  ;;  %3946 = vmatprep.subr.msk.bf16.mxu0 %vm3945_vm1, %v4365_v20 }
  0xc0   :  { %v68_v4 = vpop.permute.xlu1 %67  ;;  %3948 = vmatpush3.bf16.msk.msra.mxu0 %vm3945_vm1, %v4365_v20 }
  0xc1   :  { %vm106_vm4 = vcmp.eq.s32.totalorder %v68_v4, %v4516_v35 }
  0xc3   :  { %274 = vxpose.xlu0.b32.cont [13/16] (narrow) %v3147_v5, 64 }
  0xc4   :  { %v71_v7 = vpop.permute.xlu1 %70 }
  0xc5   :  { %vm107_vm5 = vcmp.eq.s32.totalorder %v71_v7, %v4516_v35 }
  0xc6   :  { %vm3949_vm6 = vmpackc.low %vm107_vm5, %vm106_vm4 }
  0xc7   :  { %275 = vxpose.xlu0.b32.cont [14/16] (narrow) %v3148_v8, 64  ;;  %3950 = vmatprep.subr.msk.bf16.mxu0 %vm3949_vm6, %v4365_v20  ;;  %v662_v8 = vld [vmem:[%s5352_s4] sm:$0xff] }
  0xc8   :  { %v74_v9 = vpop.permute.xlu1 %73  ;;  %3952 = vmatpush3.bf16.msk.msra.mxu0 %vm3949_vm6, %v4365_v20 }
  0xc9   :  { %vm108_vm9 = vcmp.eq.s32.totalorder %v74_v9, %v4516_v35  ;;  %v663_v9 = vld [vmem:[%s5352_s4 + $0x8] sm:$0xff] }
  0xcb   :  { %276 = vxpose.xlu0.b32.cont [15/16] (narrow) %v3149_v10, 64  ;;  %v4013_v10 = vpack.c.bf16 %v663_v9, %v662_v8 }
  0xcc   :  { %v77_v11 = vpop.permute.xlu1 %76 }
  0xcd   :  { %vm109_vm10 = vcmp.eq.s32.totalorder %v77_v11, %v4516_v35 }
  0xce   :  { %vm3953_vm11 = vmpackc.low %vm109_vm10, %vm108_vm9  ;;  %vm801_vm9 = vcmask 261120   ;;  %vm1984_vm10 = vcmask 130048  }
  0xcf   :  { %277 = vxpose.xlu0.b32.end [16/16] (narrow) %v3150_v12, 64  ;;  %3954 = vmatprep.subr.msk.bf16.mxu0 %vm3953_vm11, %v4365_v20 }
  0xd0   :  { %v80_v13 = vpop.permute.xlu1 %79  ;;  %3956 = vmatpush3.bf16.msk.msra.mxu0 %vm3953_vm11, %v4365_v20  ;;  %vm4368_vm11 = vmmov 0  }
  0xd1   :  { %vm110_vm12 = vcmp.eq.s32.totalorder %v80_v13, %v4516_v35 }
  0xd4   :  { %v83_v14 = vpop.permute.xlu1 %82 }
  0xd5   :  { %vm111_vm13 = vcmp.eq.s32.totalorder %v83_v14, %v4516_v35 }
  0xd6   :  { %vm3957_vm14 = vmpackc.low %vm111_vm13, %vm110_vm12  ;;  %vm577_vm12 = vcmp.eq.s32.totalorder %v4516_v35, 0 }
  0xd7   :  { %3958 = vmatprep.subr.msk.bf16.mxu0 %vm3957_vm14, %v4365_v20 }
  0xd8   :  { %v86_v15 = vpop.permute.xlu1 %85  ;;  %3960 = vmatpush3.bf16.msk.msra.mxu0 %vm3957_vm14, %v4365_v20 }
  0xd9   :  { %vm112_vm15 = vcmp.eq.s32.totalorder %v86_v15, %v4516_v35 }
  0xdc   :  { %v89_v16 = vpop.permute.xlu1 %88 }
  0xdd   :  { %vm113_vm0 = vcmp.eq.s32.totalorder %v89_v16, %v4516_v35  ;;  %v668_v16 = vld [vmem:[%s5352_s4 + $0x30] sm:$0xff] }
  0xde   :  { %vm3961_vm1 = vmpackc.low %vm113_vm0, %vm112_vm15 }
  0xdf   :  { %3962 = vmatprep.subr.msk.bf16.mxu0 %vm3961_vm1, %v4365_v20 }
  0xe0   :  { %v92_v17 = vpop.permute.xlu1 %91  ;;  %3964 = vmatpush3.bf16.msk.msra.mxu0 %vm3961_vm1, %v4365_v20 }
  0xe1   :  { %vm114_vm2 = vcmp.eq.s32.totalorder %v92_v17, %v4516_v35  ;;  %v669_v17 = vld [vmem:[%s5352_s4 + $0x38] sm:$0xff] }
  0xe4   :  { %v95_v18 = vpop.permute.xlu1 %94 }
  0xe5   :  { %vm115_vm3 = vcmp.eq.s32.totalorder %v95_v18, %v4516_v35 }
  0xe6   :  { %vm3965_vm4 = vmpackc.low %vm115_vm3, %vm114_vm2 }
  0xe7   :  { %3966 = vmatprep.subr.msk.bf16.mxu0 %vm3965_vm4, %v4365_v20 }
  0xe8   :  { %v98_v19 = vpop.permute.xlu1 %97  ;;  %3968 = vmatpush3.bf16.msk.msra.mxu0 %vm3965_vm4, %v4365_v20 }
  0xe9   :  { %vm116_vm5 = vcmp.eq.s32.totalorder %v98_v19, %v4516_v35 }
  0xec   :  { %v101_v21 = vpop.permute.xlu1 %100 }
  0xed   :  { %vm117_vm6 = vcmp.eq.s32.totalorder %v101_v21, %v4516_v35 }
  0xee   :  { %vm3969_vm7 = vmpackc.low %vm117_vm6, %vm116_vm5  ;;  %vm595_vm5 = vcmp.eq.s32.totalorder %v4516_v35, 1 }
  0xef   :  { %3970 = vmatprep.subr.msk.bf16.mxu0 %vm3969_vm7, %v4365_v20 }
  0xf0   :  { %3972 = vmatpush3.bf16.msk.msra.mxu0 %vm3969_vm7, %v4365_v20 }
  0xf1   :  { %3990 = vmatprep.subr.bf16.mxu0 %v3989_v40 }
 0x113   :  { %v278_v22 = vpop.trf.xlu0 }
 0x114   :  { %3578 = vmatprep.mubr.f32.mxu0 %v278_v22  ;;  %3622 = vmatprep.mubr.f32.mxu1 %v278_v22 }
 0x117   :  { %v279_v23 = vpop.trf.xlu0 }
 0x118   :  { %3579 = vmatmul.mubr.f32.vlgmr.msra.gmra.mrb[0].mxu0 %v279_v23  ;;  %3623 = vmatmul.mubr.f32.vlgmr.msra.gmra.mrb[0].mxu1 %v279_v23  ;;  %v4009_v23 = vpack.c.bf16 %v669_v17, %v668_v16 }
 0x119   :  { %3992 = vmatpush3.bf16.msra.mxu0 %v3989_v40  ;;  %4184 = vmatpush3.bf16.msra.mxu1 %v3989_v40 }
 0x11a   :  { %3994 = vmatprep.subr.bf16.mxu0 %v3993_v44  ;;  %4181 = vmatprep.subr.bf16.mxu1 %v3993_v44 }
 0x11b   :  { %v280_v24 = vpop.trf.xlu0 }
 0x11c   :  { %3581 = vmatprep.mubr.f32.mxu0 %v280_v24  ;;  %3625 = vmatprep.mubr.f32.mxu1 %v280_v24 }
 0x11d   :  { %3996 = vmatpush3.bf16.msra.mxu0 %v3993_v44  ;;  %4185 = vmatpush3.bf16.msra.mxu1 %v3993_v44 }
 0x11e   :  { %3998 = vmatprep.subr.bf16.mxu0 %v3997_v52  ;;  %4182 = vmatprep.subr.bf16.mxu1 %v3997_v52 }
 0x11f   :  { %v281_v25 = vpop.trf.xlu0 }
 0x120   :  { %3582 = vmatmul.mubr.f32.gmra.mrb[2].mxu0 %v281_v25  ;;  %3626 = vmatmul.mubr.f32.gmra.mrb[2].mxu1 %v281_v25 }
 0x121   :  { %4000 = vmatpush3.bf16.msra.mxu0 %v3997_v52  ;;  %4186 = vmatpush3.bf16.msra.mxu1 %v3997_v52 }
 0x122   :  { %4002 = vmatprep.subr.bf16.mxu0 %v4001_v56  ;;  %4183 = vmatprep.subr.bf16.mxu1 %v4001_v56 }
 0x123   :  { %v282_v26 = vpop.trf.xlu0 }
 0x124   :  { %3584 = vmatprep.mubr.f32.mxu0 %v282_v26  ;;  %3628 = vmatprep.mubr.f32.mxu1 %v282_v26 }
 0x125   :  { %4004 = vmatpush3.bf16.msra.mxu0 %v4001_v56  ;;  %4187 = vmatpush3.bf16.msra.mxu1 %v4001_v56 }
 0x126   :  { %4006 = vmatprep.subr.bf16.mxu0 %v4005_v1  ;;  %4014 = vmatprep.subr.bf16.mxu1 %v4013_v10 }
 0x127   :  { %v283_v27 = vpop.trf.xlu0 }
 0x128   :  { %3585 = vmatmul.mubr.f32.gmra.mrb[4].mxu0 %v283_v27  ;;  %3629 = vmatmul.mubr.f32.gmra.mrb[4].mxu1 %v283_v27 }
 0x12b   :  { %v284_v28 = vpop.trf.xlu0 }
 0x12c   :  { %3587 = vmatprep.mubr.f32.mxu0 %v284_v28  ;;  %3631 = vmatprep.mubr.f32.mxu1 %v284_v28 }
 0x12f   :  { %v285_v29 = vpop.trf.xlu0 }
 0x130   :  { %3632 = vmatmul.mubr.f32.gmra.mrb[6].mxu1 %v285_v29  ;;  %3588 = vmatmul.mubr.f32.gmra.mrb[6].mxu0 %v285_v29 }
 0x1eb   :  { %v4582_v30 = vpop.f32.mrb[0].mxu0  ;;  %v3624_v31 = vpop.f32.mrb[0].mxu1 }
 0x1ec   :  { %v505_v32 = vmax.f32 %v3624_v31, 1.0  ;;  %v4584_v33 = vpop.f32.mrb[1].mxu0  ;;  %v465_v36 = vpop.f32.mrb[1].mxu1 }
 0x1ed   :  { %v504_v41 = vmax.f32 %v465_v36, 1.0 }
 0x1ee   :  { %519 = vperm.xlu1 %4220, %v505_v32   ;;  %v664_v32 = vld [vmem:[%s5352_s4 + $0x10] sm:$0xff] }
 0x1f2   :  { %514 = vperm.xlu1 %4220, %v504_v41  }
 0x1f3   :  { %v4610_v45 = vpop.f32.mrb[2].mxu0  ;;  %v3627_v46 = vpop.f32.mrb[2].mxu1 }
 0x1f4   :  { %v507_v47 = vmax.f32 %v3627_v46, 1.0  ;;  %v4612_v48 = vpop.f32.mrb[3].mxu0  ;;  %v475_v49 = vpop.f32.mrb[3].mxu1 }
 0x1f5   :  { %v506_v53 = vmax.f32 %v475_v49, 1.0 }
 0x1f6   :  { %529 = vperm.xlu1 %4220, %v507_v47  }
 0x1fa   :  { %524 = vperm.xlu1 %4220, %v506_v53  }
 0x1fb   :  { %v4638_v57 = vpop.f32.mrb[4].mxu0  ;;  %v3630_v58 = vpop.f32.mrb[4].mxu1 }
 0x1fc   :  { %v509_v59 = vmax.f32 %v3630_v58, 1.0  ;;  %v4640_v60 = vpop.f32.mrb[5].mxu0  ;;  %v485_v61 = vpop.f32.mrb[5].mxu1 }
 0x1fd   :  { %v508_v62 = vmax.f32 %v485_v61, 1.0  ;;  %v3199_v61 = vld [vmem:[%s5352_s4 + $0x40] ss:$0 sm:$0xff] }
 0x1fe   :  { %539 = vperm.xlu1 %4220, %v509_v59  }
 0x202   :  { %534 = vperm.xlu1 %4220, %v508_v62  }
 0x203   :  { %v3633_v2 = vpop.f32.mrb[6].mxu1  ;;  %v4648_v3 = vpop.f32.mrb[6].mxu0 }
 0x204   :  { %v511_v4 = vmax.f32 %v3633_v2, 1.0  ;;  %v495_v5 = vpop.f32.mrb[7].mxu1  ;;  %v390_v6 = vpop.f32.mrb[7].mxu0 }
 0x205   :  { %v510_v7 = vmax.f32 %v495_v5, 1.0 }
 0x206   :  { %549 = vperm.xlu0 %4219, %v511_v4  }
 0x207   :  { %544 = vperm.xlu1 %4220, %v510_v7  }
 0x26d   :  { %v520_v11 = vpop.permute.xlu1 %519 }
 0x26e   :  { %4221 = vrcp.f32 %v520_v11 }
 0x271   :  { %v515_v12 = vpop.permute.xlu1 %514 }
 0x272   :  { %4223 = vrcp.f32 %v515_v12 }
 0x275   :  { %v530_v13 = vpop.permute.xlu1 %529 }
 0x276   :  { %4225 = vrcp.f32 %v530_v13 }
 0x278   :  { %v4222_v15 = vpop.eup %4221 }
 0x279   :  { %v525_v14 = vpop.permute.xlu1 %524  ;;  %v4666_v22 = vmul.f32 %v4222_v15, %v4582_v30 }
 0x27a   :  { %4227 = vrcp.f32 %v525_v14 }
 0x27c   :  { %v4224_v18 = vpop.eup %4223 }
 0x27d   :  { %v540_v19 = vpop.permute.xlu1 %539  ;;  %v4663_v21 = vmul.f32 %v4224_v18, %v4584_v33  ;;  %v665_v33 = vld [vmem:[%s5352_s4 + $0x18] sm:$0xff] }
 0x27e   :  { %4229 = vrcp.f32 %v540_v19  ;;  %v4017_v41 = vpack.c.bf16 %v665_v33, %v664_v32 }
 0x27f   :  { %3650 = vmatprep.mubr.msk.f32.mxu0 %vm671_vm8, %v4663_v21 }
 0x280   :  { %3651 = vmatmul.mubr.msk.f32.vlgmr.msra.gmra.mrb[8].mxu0 %vm671_vm8, %v4666_v22  ;;  %v4226_v25 = vpop.eup %4225 }
 0x281   :  { %v535_v24 = vpop.permute.xlu1 %534  ;;  %4008 = vmatpush3.bf16.msra.mxu0 %v4005_v1  ;;  %v4676_v30 = vmul.f32 %v4226_v25, %v4610_v45 }
 0x282   :  { %4231 = vrcp.f32 %v535_v24  ;;  %4010 = vmatprep.subr.bf16.mxu0 %v4009_v23 }
 0x284   :  { %v4228_v26 = vpop.eup %4227 }
 0x285   :  { %v550_v27 = vpop.permute.xlu0 %549  ;;  %v4673_v28 = vmul.f32 %v4228_v26, %v4612_v48  ;;  %4012 = vmatpush3.bf16.msra.mxu0 %v4009_v23 }
 0x286   :  { %4233 = vrcp.f32 %v550_v27  ;;  %v545_v29 = vpop.permute.xlu1 %544 }
 0x287   :  { %4235 = vrcp.f32 %v545_v29  ;;  %3653 = vmatprep.mubr.msk.f32.mxu0 %vm671_vm8, %v4673_v28 }
 0x288   :  { %3654 = vmatmul.mubr.msk.f32.gmra.mrb[10].mxu0 %vm671_vm8, %v4676_v30  ;;  %v4230_v31 = vpop.eup %4229 }
 0x289   :  { %3670 = vmatprep.mubr.msk.f32.mxu0 %vm801_vm9, %v4589_v37  ;;  %v4698_v37 = vmul.f32 %v4230_v31, %v4638_v57 }
 0x28c   :  { %v4232_v36 = vpop.eup %4231  ;;  %3671 = vmatmul.mubr.msk.f32.vlgmr.msra.gmra.mrb[12].mxu0 %vm801_vm9, %v4594_v39 }
 0x28d   :  { %v4693_v40 = vmul.f32 %v4232_v36, %v4640_v60  ;;  %3673 = vmatprep.mubr.msk.f32.mxu0 %vm801_vm9, %v4601_v42 }
 0x28f   :  { %3656 = vmatprep.mubr.msk.f32.mxu1 %vm671_vm8, %v4693_v40 }
 0x290   :  { %v4234_v44 = vpop.eup %4233  ;;  %3657 = vmatmul.mubr.msk.f32.vlgmr.msra.gmra.mrb[8].mxu1 %vm671_vm8, %v4698_v37  ;;  %3674 = vmatmul.mubr.msk.f32.gmra.mrb[14].mxu0 %vm801_vm9, %v4606_v43 }
 0x291   :  { %v4236_v39 = vpop.eup %4235  ;;  %3676 = vmatprep.mubr.msk.f32.mxu0 %vm801_vm9, %v4617_v50  ;;  %4016 = vmatpush3.bf16.msra.mxu1 %v4013_v10  ;;  %v4711_v45 = vmul.f32 %v4234_v44, %v4648_v3 }
 0x292   :  { %v4708_v42 = vmul.f32 %v4236_v39, %v390_v6  ;;  %4018 = vmatprep.subr.bf16.mxu1 %v4017_v41 }
 0x294   :  { %3659 = vmatprep.mubr.msk.f32.mxu1 %vm671_vm8, %v4708_v42  ;;  %3677 = vmatmul.mubr.msk.f32.gmra.mrb[16].mxu0 %vm801_vm9, %v4622_v51 }
 0x295   :  { %3660 = vmatmul.mubr.msk.f32.gmra.mrb[10].mxu1 %vm671_vm8, %v4711_v45  ;;  %3679 = vmatprep.mubr.msk.f32.mxu0 %vm801_vm9, %v4629_v54 }
 0x296   :  { %4020 = vmatpush3.bf16.msra.mxu1 %v4017_v41 }
 0x298   :  { %3680 = vmatmul.mubr.msk.f32.gmra.mrb[18].mxu0 %vm801_vm9, %v4634_v55 }
 0x299   :  { %3718 = vmatprep.mubr.msk.f32.mxu0 %vm671_vm8, %v4663_v21 }
 0x353   :  { %v3652_v43 = vpop.f32.mrb[8].mxu0 }
 0x354   :  { %v762_v46 = vpop.f32.mrb[9].mxu0 }
 0x355   :  { %3690 = vmatprep.mubr.msk.f32.mxu1 %vm801_vm9, %v762_v46 }
 0x356   :  { %3691 = vmatmul.mubr.msk.f32.vlgmr.msra.gmra.mrb[12].mxu1 %vm801_vm9, %v3652_v43 }
 0x35b   :  { %v3655_v47 = vpop.f32.mrb[10].mxu0 }
 0x35c   :  { %v772_v48 = vpop.f32.mrb[11].mxu0 }
 0x35d   :  { %3693 = vmatprep.mubr.msk.f32.mxu1 %vm801_vm9, %v772_v48 }
 0x35e   :  { %3694 = vmatmul.mubr.msk.f32.gmra.mrb[14].mxu1 %vm801_vm9, %v3655_v47 }
 0x35f   :  { %v3672_v49 = vpop.f32.mrb[12].mxu0 }
 0x360   :  { %v892_v54 = vpop.f32.mrb[13].mxu0 }
 0x363   :  { %v3658_v50 = vpop.f32.mrb[8].mxu1  ;;  %v3675_v55 = vpop.f32.mrb[14].mxu0 }
 0x364   :  { %v782_v51 = vpop.f32.mrb[9].mxu1  ;;  %v902_v56 = vpop.f32.mrb[15].mxu0 }
 0x365   :  { %3696 = vmatprep.mubr.msk.f32.mxu1 %vm801_vm9, %v782_v51 }
 0x366   :  { %3697 = vmatmul.mubr.msk.f32.gmra.mrb[16].mxu1 %vm801_vm9, %v3658_v50 }
 0x367   :  { %v3678_v57 = vpop.f32.mrb[16].mxu0 }
 0x368   :  { %v3661_v52 = vpop.f32.mrb[10].mxu1  ;;  %v912_v58 = vpop.f32.mrb[17].mxu0 }
 0x369   :  { %v792_v53 = vpop.f32.mrb[11].mxu1 }
 0x36a   :  { %3699 = vmatprep.mubr.msk.f32.mxu1 %vm801_vm9, %v792_v53 }
 0x36b   :  { %3700 = vmatmul.mubr.msk.f32.gmra.mrb[18].mxu1 %vm801_vm9, %v3661_v52  ;;  %v3681_v59 = vpop.f32.mrb[18].mxu0 }
 0x36c   :  { %3802 = vmatprep.mubr.msk.f32.mxu1 %vm671_vm8, %v4663_v21  ;;  %v922_v60 = vpop.f32.mrb[19].mxu0 }
 0x429   :  { %v3692_v62 = vpop.f32.mrb[12].mxu1 }
 0x42a   :  { %v1027_v63 = vadd.f32 %v3692_v62, %v3672_v49  ;;  %v1021_v0 = vpop.f32.mrb[13].mxu1 }
 0x42b   :  { %v1022_v1 = vadd.f32 %v1021_v0, %v892_v54 }
 0x42c   :  { %v1065_v2 = vadd.f32 %v3199_v61, %v1027_v63 }
 0x42d   :  { %v1064_v3 = vadd.f32 %v3199_v61, %v1022_v1 }
 0x42e   :  { %v1073_v4 = vmul.f32 %v1065_v2, %v1065_v2 }
 0x42f   :  { %v1072_v6 = vmul.f32 %v1064_v3, %v1064_v3 }
 0x430   :  { %v1083_v5 = vsel %vm671_vm8, %v1073_v4, 0.0 }
 0x431   :  { %1084 = vadd.xlane.f32.xlu1 %v1083_v5  ;;  %v3695_v7 = vpop.f32.mrb[14].mxu1  ;;  %v1080_v12 = vsel %vm671_vm8, %v1072_v6, 0.0 }
 0x432   :  { %v1037_v8 = vadd.f32 %v3695_v7, %v3675_v55  ;;  %v1031_v9 = vpop.f32.mrb[15].mxu1 }
 0x433   :  { %v1032_v10 = vadd.f32 %v1031_v9, %v902_v56 }
 0x434   :  { %v1067_v11 = vadd.f32 %v3199_v61, %v1037_v8 }
 0x435   :  { %v1066_v13 = vadd.f32 %v3199_v61, %v1032_v10  ;;  %1081 = vadd.xlane.f32.xlu1 %v1080_v12 }
 0x436   :  { %v1075_v14 = vmul.f32 %v1067_v11, %v1067_v11 }
 0x437   :  { %v1074_v15 = vmul.f32 %v1066_v13, %v1066_v13 }
 0x438   :  { %v1089_v16 = vsel %vm671_vm8, %v1075_v14, 0.0 }
 0x439   :  { %v3698_v17 = vpop.f32.mrb[16].mxu1  ;;  %1090 = vadd.xlane.f32.xlu1 %v1089_v16  ;;  %v1086_v18 = vsel %vm671_vm8, %v1074_v15, 0.0 }
 0x43a   :  { %v1047_v19 = vadd.f32 %v3698_v17, %v3678_v57  ;;  %v1041_v21 = vpop.f32.mrb[17].mxu1  ;;  %1087 = vadd.xlane.f32.xlu0 %v1086_v18 }
 0x43b   :  { %v1042_v23 = vadd.f32 %v1041_v21, %v912_v58 }
 0x43c   :  { %v4742_v24 = vadd.f32 %v3199_v61, %v1047_v19 }
 0x43d   :  { %v4744_v25 = vadd.f32 %v3199_v61, %v1042_v23 }
 0x43e   :  { %v3701_v26 = vpop.f32.mrb[18].mxu1  ;;  %v1077_v27 = vmul.f32 %v4742_v24, %v4742_v24 }
 0x43f   :  { %v1057_v29 = vadd.f32 %v3701_v26, %v3681_v59  ;;  %v1051_v31 = vpop.f32.mrb[19].mxu1  ;;  %v1076_v36 = vmul.f32 %v4744_v25, %v4744_v25 }
 0x440   :  { %v1052_v32 = vadd.f32 %v1051_v31, %v922_v60  ;;  %v1095_v33 = vsel %vm671_vm8, %v1077_v27, 0.0 }
 0x441   :  { %1096 = vadd.xlane.f32.xlu1 %v1095_v33  ;;  %v4751_v44 = vadd.f32 %v3199_v61, %v1057_v29  ;;  %v1092_v39 = vsel %vm671_vm8, %v1076_v36, 0.0 }
 0x442   :  { %v1070_v41 = vadd.f32 %v3199_v61, %v1052_v32  ;;  %v1144_v32 = vld [vmem:[%s5352_s4 + $0x88] sm:$0xff] }
 0x443   :  { %v1079_v47 = vmul.f32 %v4751_v44, %v4751_v44 }
 0x444   :  { %v1078_v43 = vmul.f32 %v1070_v41, %v1070_v41 }
 0x445   :  { %1093 = vadd.xlane.f32.xlu1 %v1092_v39  ;;  %v1101_v48 = vsel %vm671_vm8, %v1079_v47, 0.0  ;;  %v1149_v47 = vld [vmem:[%s5352_s4 + $0xb0] sm:$0xff] }
 0x446   :  { %v1098_v46 = vsel %vm671_vm8, %v1078_v43, 0.0 }
 0x449   :  { %1099 = vadd.xlane.f32.xlu1 %v1098_v46  ;;  %v1148_v46 = vld [vmem:[%s5352_s4 + $0xa8] sm:$0xff] }
 0x44d   :  { %1102 = vadd.xlane.f32.xlu1 %v1101_v48  ;;  %v4045_v48 = vpack.c.bf16 %v1149_v47, %v1148_v46 }
 0x4be   :  { %v1085_v49 = vpop.xlane.xlu1 %1084 }
 0x4bf   :  { %v1105_v50 = vmax.f32 %v1085_v49, 1e-24  ;;  %v1150_v49 = vld [vmem:[%s5352_s4 + $0xb8] sm:$0xff] }
 0x4c1   :  { %4237 = vrsqrt.f32 %v1105_v50  ;;  %v1151_v50 = vld [vmem:[%s5352_s4 + $0xc0] sm:$0xff] }
 0x4c2   :  { %v1082_v51 = vpop.xlane.xlu1 %1081 }
 0x4c3   :  { %v1104_v52 = vmax.f32 %v1082_v51, 1e-24  ;;  %v4049_v51 = vpack.c.bf16 %v1151_v50, %v1150_v49 }
 0x4c5   :  { %4239 = vrsqrt.f32 %v1104_v52  ;;  %v1136_v52 = vld [vmem:[%s5352_s4 + $0x48] sm:$0xff] }
 0x4c6   :  { %v1091_v53 = vpop.xlane.xlu1 %1090 }
 0x4c7   :  { %v1107_v54 = vmax.f32 %v1091_v53, 1e-24  ;;  %v1088_v55 = vpop.xlane.xlu0 %1087  ;;  %v1137_v53 = vld [vmem:[%s5352_s4 + $0x50] sm:$0xff] }
 0x4c8   :  { %v1106_v56 = vmax.f32 %v1088_v55, 1e-24  ;;  %v1138_v55 = vld [vmem:[%s5352_s4 + $0x58] sm:$0xff] }
 0x4c9   :  { %4241 = vrsqrt.f32 %v1107_v54  ;;  %v4053_v54 = vpack.c.bf16 %v1137_v53, %v1136_v52 }
 0x4ca   :  { %4243 = vrsqrt.f32 %v1106_v56  ;;  %v1139_v56 = vld [vmem:[%s5352_s4 + $0x60] sm:$0xff] }
 0x4cb   :  { %v4238_v57 = vpop.eup %4237 }
 0x4cc   :  { %v4758_v59 = vmul.f32 %v4238_v57, %v1065_v2  ;;  %v4057_v57 = vpack.c.bf16 %v1139_v56, %v1138_v55 }
 0x4ce   :  { %v1097_v58 = vpop.xlane.xlu1 %1096  ;;  %v1129_v1 = vmax.f32 %v4758_v59, 0.0 }
 0x4cf   :  { %v4240_v60 = vpop.eup %4239  ;;  %v1109_v61 = vmax.f32 %v1097_v58, 1e-24  ;;  %v1140_v58 = vld [vmem:[%s5352_s4 + $0x68] sm:$0xff] }
 0x4d0   :  { %v4760_v62 = vmul.f32 %v4240_v60, %v1064_v3  ;;  %v1141_v60 = vld [vmem:[%s5352_s4 + $0x70] sm:$0xff] }
 0x4d1   :  { %4245 = vrsqrt.f32 %v1109_v61  ;;  %v4061_v61 = vpack.c.bf16 %v1141_v60, %v1140_v58 }
 0x4d2   :  { %v1094_v63 = vpop.xlane.xlu1 %1093  ;;  %v1128_v0 = vmax.f32 %v4760_v62, 0.0  ;;  %v1142_v62 = vld [vmem:[%s5352_s4 + $0x78] sm:$0xff] }
 0x4d3   :  { %v4242_v4 = vpop.eup %4241  ;;  %v1108_v5 = vmax.f32 %v1094_v63, 1e-24  ;;  %v1143_v63 = vld [vmem:[%s5352_s4 + $0x80] sm:$0xff] }
 0x4d4   :  { %v4244_v6 = vpop.eup %4243  ;;  %v4021_v7 = vpack.c.bf16 %v1129_v1, %v1128_v0  ;;  %v4768_v2 = vmul.f32 %v4242_v4, %v1067_v11  ;;  %v4065_v59 = vpack.c.bf16 %v1143_v63, %v1142_v62 }
 0x4d5   :  { %4247 = vrsqrt.f32 %v1108_v5  ;;  %v4770_v8 = vmul.f32 %v4244_v6, %v1066_v13 }
 0x4d6   :  { %4022 = vmatprep.subr.bf16.mxu0 %v4021_v7  ;;  %v1100_v3 = vpop.xlane.xlu1 %1099  ;;  %v1131_v9 = vmax.f32 %v4768_v2, 0.0 }
 0x4d7   :  { %v1110_v10 = vmax.f32 %v1100_v3, 1e-24  ;;  %4024 = vmatpush3.bf16.msra.mxu0 %v4021_v7  ;;  %v1130_v12 = vmax.f32 %v4770_v8, 0.0  ;;  %v3224_v3 = vld [vmem:[%s5352_s4 + $0xc8] ss:$0 sm:$0xff] }
 0x4d9   :  { %4249 = vrsqrt.f32 %v1110_v10  ;;  %v4025_v14 = vpack.c.bf16 %v1131_v9, %v1130_v12 }
 0x4da   :  { %v1103_v15 = vpop.xlane.xlu1 %1102 }
 0x4db   :  { %v4246_v11 = vpop.eup %4245  ;;  %v1111_v16 = vmax.f32 %v1103_v15, 1e-24  ;;  %4026 = vmatprep.subr.bf16.mxu0 %v4025_v14 }
 0x4dc   :  { %4028 = vmatpush3.bf16.msra.mxu0 %v4025_v14  ;;  %v4779_v13 = vmul.f32 %v4246_v11, %v4742_v24  ;;  %v1145_v24 = vld [vmem:[%s5352_s4 + $0x90] sm:$0xff] }
 0x4dd   :  { %4251 = vrsqrt.f32 %v1111_v16  ;;  %v4037_v39 = vpack.c.bf16 %v1145_v24, %v1144_v32 }
 0x4de   :  { %v1133_v21 = vmax.f32 %v4779_v13, 0.0 }
 0x4df   :  { %v4248_v17 = vpop.eup %4247 }
 0x4e0   :  { %v1124_v18 = vmul.f32 %v4248_v17, %v4744_v25 }
 0x4e2   :  { %v1132_v19 = vmax.f32 %v1124_v18, 0.0 }
 0x4e3   :  { %v4250_v23 = vpop.eup %4249 }
 0x4e4   :  { %v4029_v26 = vpack.c.bf16 %v1133_v21, %v1132_v19  ;;  %v1126_v27 = vmul.f32 %v4250_v23, %v1070_v41  ;;  %v1146_v41 = vld [vmem:[%s5352_s4 + $0x98] sm:$0xff] }
 0x4e6   :  { %4030 = vmatprep.subr.bf16.mxu0 %v4029_v26  ;;  %v1134_v25 = vmax.f32 %v1126_v27, 0.0 }
 0x4e7   :  { %v4252_v29 = vpop.eup %4251  ;;  %4032 = vmatpush3.bf16.msra.mxu0 %v4029_v26 }
 0x4e8   :  { %v1127_v31 = vmul.f32 %v4252_v29, %v4751_v44  ;;  %v1147_v44 = vld [vmem:[%s5352_s4 + $0xa0] sm:$0xff] }
 0x4e9   :  { %v4041_v43 = vpack.c.bf16 %v1147_v44, %v1146_v41 }
 0x4ea   :  { %v1135_v33 = vmax.f32 %v1127_v31, 0.0 }
 0x4ec   :  { %v4033_v36 = vpack.c.bf16 %v1135_v33, %v1134_v25 }
 0x4ee   :  { %4034 = vmatprep.subr.bf16.mxu0 %v4033_v36 }
 0x4ef   :  { %4036 = vmatpush3.bf16.msra.mxu0 %v4033_v36 }
 0x4f0   :  { %4038 = vmatprep.subr.bf16.mxu0 %v4037_v39 }
 0x4f2   :  { %3719 = vmatmul.mubr.msk.f32.vlgmr.msra.gmra.mrb[20].mxu0 %vm671_vm8, %v4666_v22 }
 0x4f3   :  { %3721 = vmatprep.mubr.msk.f32.mxu0 %vm671_vm8, %v4673_v28  ;;  %4040 = vmatpush3.bf16.msra.mxu0 %v4037_v39 }
 0x4f4   :  { %4042 = vmatprep.subr.bf16.mxu0 %v4041_v43 }
 0x4f6   :  { %3722 = vmatmul.mubr.msk.f32.gmra.mrb[22].mxu0 %vm671_vm8, %v4676_v30 }
 0x4f7   :  { %3724 = vmatprep.mubr.msk.f32.mxu0 %vm671_vm8, %v4693_v40  ;;  %4044 = vmatpush3.bf16.msra.mxu0 %v4041_v43 }
 0x4f8   :  { %4046 = vmatprep.subr.bf16.mxu0 %v4045_v48 }
 0x4fa   :  { %3725 = vmatmul.mubr.msk.f32.gmra.mrb[24].mxu0 %vm671_vm8, %v4698_v37 }
 0x4fb   :  { %3727 = vmatprep.mubr.msk.f32.mxu0 %vm671_vm8, %v4708_v42  ;;  %4048 = vmatpush3.bf16.msra.mxu0 %v4045_v48 }
 0x4fc   :  { %4050 = vmatprep.subr.bf16.mxu0 %v4049_v51 }
 0x4fe   :  { %3728 = vmatmul.mubr.msk.f32.gmra.mrb[26].mxu0 %vm671_vm8, %v4711_v45 }
 0x4ff   :  { %4052 = vmatpush3.bf16.msra.mxu0 %v4049_v51  ;;  %3746 = vmatprep.mubr.msk.f32.mxu0 %vm671_vm8, %v1128_v0 }
 0x500   :  { %4054 = vmatprep.subr.bf16.mxu0 %v4053_v54 }
 0x502   :  { %3747 = vmatmul.mubr.msk.f32.vlgmr.msra.gmra.mrb[28].mxu0 %vm671_vm8, %v1129_v1 }
 0x503   :  { %3749 = vmatprep.mubr.msk.f32.mxu0 %vm671_vm8, %v1130_v12  ;;  %4056 = vmatpush3.bf16.msra.mxu0 %v4053_v54 }
 0x504   :  { %4058 = vmatprep.subr.bf16.mxu0 %v4057_v57 }
 0x506   :  { %3750 = vmatmul.mubr.msk.f32.gmra.mrb[30].mxu0 %vm671_vm8, %v1131_v9 }
 0x507   :  { %3752 = vmatprep.mubr.msk.f32.mxu0 %vm671_vm8, %v1132_v19  ;;  %4060 = vmatpush3.bf16.msra.mxu0 %v4057_v57 }
 0x508   :  { %4062 = vmatprep.subr.bf16.mxu0 %v4061_v61 }
 0x50a   :  { %3753 = vmatmul.mubr.msk.f32.gmra.mrb[32].mxu0 %vm671_vm8, %v1133_v21 }
 0x50b   :  { %3755 = vmatprep.mubr.msk.f32.mxu0 %vm671_vm8, %v1134_v25  ;;  %4064 = vmatpush3.bf16.msra.mxu0 %v4061_v61 }
 0x50c   :  { %4066 = vmatprep.subr.bf16.mxu0 %v4065_v59 }
 0x50e   :  { %3756 = vmatmul.mubr.msk.f32.gmra.mrb[34].mxu0 %vm671_vm8, %v1135_v33 }
 0x50f   :  { %4068 = vmatpush3.bf16.msra.mxu0 %v4065_v59 }
 0x5c5   :  { %v3720_v0 = vpop.f32.mrb[20].mxu0 }
 0x5c6   :  { %v1219_v1 = vpop.f32.mrb[21].mxu0 }
 0x5c7   :  { %3774 = vmatprep.mubr.msk.f32.mxu0 %vm671_vm8, %v1219_v1 }
 0x5c8   :  { %3775 = vmatmul.mubr.msk.f32.vlgmr.msra.gmra.mrb[28].mxu0 %vm671_vm8, %v3720_v0 }
 0x5c9   :  { %v3723_v4 = vpop.f32.mrb[22].mxu0 }
 0x5ca   :  { %v1229_v5 = vpop.f32.mrb[23].mxu0 }
 0x5cb   :  { %3777 = vmatprep.mubr.msk.f32.mxu0 %vm671_vm8, %v1229_v5 }
 0x5cc   :  { %3778 = vmatmul.mubr.msk.f32.gmra.mrb[30].mxu0 %vm671_vm8, %v3723_v4 }
 0x5cd   :  { %v3726_v6 = vpop.f32.mrb[24].mxu0 }
 0x5ce   :  { %v1239_v7 = vpop.f32.mrb[25].mxu0 }
 0x5cf   :  { %3780 = vmatprep.mubr.msk.f32.mxu0 %vm671_vm8, %v1239_v7 }
 0x5d0   :  { %3781 = vmatmul.mubr.msk.f32.gmra.mrb[32].mxu0 %vm671_vm8, %v3726_v6 }
 0x5d1   :  { %v3729_v2 = vpop.f32.mrb[26].mxu0 }
 0x5d2   :  { %v1249_v8 = vpop.f32.mrb[27].mxu0 }
 0x5d3   :  { %3783 = vmatprep.mubr.msk.f32.mxu0 %vm671_vm8, %v1249_v8 }
 0x5d4   :  { %3784 = vmatmul.mubr.msk.f32.gmra.mrb[34].mxu0 %vm671_vm8, %v3729_v2 }
 0x5d5   :  { %3870 = vmatprep.mubr.msk.f32.mxu0 %vm4368_vm11, %v4366_v38 }
 0x69b   :  { %v3776_v9 = vpop.f32.mrb[28].mxu0 }
 0x69c   :  { %v1521_v10 = vadd.f32 %v3776_v9, %v3224_v3  ;;  %v1477_v12 = vpop.f32.mrb[29].mxu0 }
 0x69d   :  { %v4873_v14 = vadd.f32 %v3224_v3, %v1477_v12 }
 0x69e   :  { %v1529_v15 = vmul.f32 %v1521_v10, %v1521_v10 }
 0x69f   :  { %v3779_v11 = vpop.f32.mrb[30].mxu0  ;;  %v1528_v18 = vmul.f32 %v4873_v14, %v4873_v14 }
 0x6a0   :  { %v4875_v16 = vadd.f32 %v3779_v11, %v3224_v3  ;;  %v1487_v13 = vpop.f32.mrb[31].mxu0  ;;  %v1539_v17 = vsel %vm801_vm9, %v1529_v15, 0.0 }
 0x6a1   :  { %v4880_v19 = vadd.f32 %v3224_v3, %v1487_v13  ;;  %1540 = vadd.xlane.f32.xlu1 %v1539_v17  ;;  %v1536_v29 = vsel %vm801_vm9, %v1528_v18, 0.0 }
 0x6a2   :  { %v1531_v21 = vmul.f32 %v4875_v16, %v4875_v16 }
 0x6a3   :  { %v3782_v23 = vpop.f32.mrb[32].mxu0  ;;  %v1530_v32 = vmul.f32 %v4880_v19, %v4880_v19 }
 0x6a4   :  { %v4884_v26 = vadd.f32 %v3782_v23, %v3224_v3  ;;  %v1497_v27 = vpop.f32.mrb[33].mxu0  ;;  %v1545_v31 = vsel %vm801_vm9, %v1531_v21, 0.0 }
 0x6a5   :  { %v4890_v24 = vadd.f32 %v3224_v3, %v1497_v27  ;;  %1537 = vadd.xlane.f32.xlu1 %v1536_v29  ;;  %1546 = vadd.xlane.f32.xlu0 %v1545_v31  ;;  %v1542_v41 = vsel %vm801_vm9, %v1530_v32, 0.0 }
 0x6a6   :  { %v1533_v25 = vmul.f32 %v4884_v26, %v4884_v26 }
 0x6a7   :  { %v3785_v33 = vpop.f32.mrb[34].mxu0  ;;  %v1532_v43 = vmul.f32 %v4890_v24, %v4890_v24 }
 0x6a8   :  { %v4894_v36 = vadd.f32 %v3785_v33, %v3224_v3  ;;  %v1507_v39 = vpop.f32.mrb[35].mxu0  ;;  %v1551_v44 = vsel %vm801_vm9, %v1533_v25, 0.0 }
 0x6a9   :  { %v4900_v46 = vadd.f32 %v3224_v3, %v1507_v39  ;;  %1543 = vadd.xlane.f32.xlu1 %v1542_v41  ;;  %1552 = vadd.xlane.f32.xlu0 %v1551_v44  ;;  %v1548_v48 = vsel %vm801_vm9, %v1532_v43, 0.0  ;;  %v1597_v41 = vld [vmem:[%s5352_s4 + $0xf8] sm:$0xff] }
 0x6aa   :  { %v1535_v47 = vmul.f32 %v4894_v36, %v4894_v36 }
 0x6ab   :  { %v1534_v50 = vmul.f32 %v4900_v46, %v4900_v46 }
 0x6ac   :  { %v1557_v49 = vsel %vm801_vm9, %v1535_v47, 0.0 }
 0x6ad   :  { %1549 = vadd.xlane.f32.xlu1 %v1548_v48  ;;  %1558 = vadd.xlane.f32.xlu0 %v1557_v49  ;;  %v1554_v51 = vsel %vm801_vm9, %v1534_v50, 0.0  ;;  %v1592_v49 = vld [vmem:[%s5352_s4 + $0xd0] sm:$0xff]  ;;  %v1593_v50 = vld [vmem:[%s5352_s4 + $0xd8] sm:$0xff] }
 0x6b1   :  { %1555 = vadd.xlane.f32.xlu1 %v1554_v51  ;;  %v4093_v51 = vpack.c.bf16 %v1593_v50, %v1592_v49 }
 0x72e   :  { %v1541_v52 = vpop.xlane.xlu1 %1540 }
 0x72f   :  { %v1561_v53 = vmax.f32 %v1541_v52, 1e-24 }
 0x731   :  { %4253 = vrsqrt.f32 %v1561_v53 }
 0x732   :  { %v1538_v54 = vpop.xlane.xlu1 %1537  ;;  %v1547_v55 = vpop.xlane.xlu0 %1546 }
 0x733   :  { %v1560_v56 = vmax.f32 %v1538_v54, 1e-24  ;;  %v1563_v57 = vmax.f32 %v1547_v55, 1e-24 }
 0x735   :  { %4255 = vrsqrt.f32 %v1560_v56  ;;  %v3249_v56 = vld [vmem:[%s5352_s4 + $0x110] ss:$0 sm:$0xff] }
 0x736   :  { %4257 = vrsqrt.f32 %v1563_v57  ;;  %v1544_v58 = vpop.xlane.xlu1 %1543  ;;  %v1553_v60 = vpop.xlane.xlu0 %1552 }
 0x737   :  { %v1562_v61 = vmax.f32 %v1544_v58, 1e-24  ;;  %v1565_v62 = vmax.f32 %v1553_v60, 1e-24 }
 0x739   :  { %4259 = vrsqrt.f32 %v1562_v61 }
 0x73a   :  { %4261 = vrsqrt.f32 %v1565_v62  ;;  %v1550_v63 = vpop.xlane.xlu1 %1549  ;;  %v1559_v59 = vpop.xlane.xlu0 %1558 }
 0x73b   :  { %v4254_v0 = vpop.eup %4253  ;;  %v1564_v1 = vmax.f32 %v1550_v63, 1e-24  ;;  %v1567_v4 = vmax.f32 %v1559_v59, 1e-24 }
 0x73c   :  { %v4909_v6 = vmul.f32 %v4254_v0, %v1521_v10 }
 0x73d   :  { %4263 = vrsqrt.f32 %v1564_v1 }
 0x73e   :  { %4265 = vrsqrt.f32 %v1567_v4  ;;  %v1556_v5 = vpop.xlane.xlu1 %1555  ;;  %v1585_v12 = vmax.f32 %v4909_v6, 0.0 }
 0x73f   :  { %v4256_v7 = vpop.eup %4255  ;;  %v1566_v2 = vmax.f32 %v1556_v5, 1e-24 }
 0x740   :  { %v4258_v8 = vpop.eup %4257  ;;  %v1576_v3 = vmul.f32 %v4256_v7, %v4873_v14 }
 0x741   :  { %4267 = vrsqrt.f32 %v1566_v2  ;;  %v1579_v15 = vmul.f32 %v4258_v8, %v4875_v16 }
 0x742   :  { %v1584_v9 = vmax.f32 %v1576_v3, 0.0 }
 0x743   :  { %v4260_v11 = vpop.eup %4259  ;;  %v1587_v10 = vmax.f32 %v1579_v15, 0.0 }
 0x744   :  { %v4262_v13 = vpop.eup %4261  ;;  %v4069_v17 = vpack.c.bf16 %v1585_v12, %v1584_v9  ;;  %v1578_v18 = vmul.f32 %v4260_v11, %v4880_v19 }
 0x745   :  { %v1581_v23 = vmul.f32 %v4262_v13, %v4884_v26  ;;  %v1596_v26 = vld [vmem:[%s5352_s4 + $0xf0] sm:$0xff] }
 0x746   :  { %4070 = vmatprep.subr.bf16.mxu1 %v4069_v17  ;;  %v1586_v21 = vmax.f32 %v1578_v18, 0.0  ;;  %v4085_v47 = vpack.c.bf16 %v1597_v41, %v1596_v26 }
 0x747   :  { %v4264_v27 = vpop.eup %4263  ;;  %4072 = vmatpush3.bf16.msra.mxu1 %v4069_v17  ;;  %v1589_v25 = vmax.f32 %v1581_v23, 0.0 }
 0x748   :  { %v4266_v29 = vpop.eup %4265  ;;  %v4073_v14 = vpack.c.bf16 %v1587_v10, %v1586_v21  ;;  %v1580_v31 = vmul.f32 %v4264_v27, %v4890_v24 }
 0x749   :  { %v1583_v16 = vmul.f32 %v4266_v29, %v4894_v36  ;;  %v1598_v36 = vld [vmem:[%s5352_s4 + $0x100] sm:$0xff] }
 0x74a   :  { %4074 = vmatprep.subr.bf16.mxu1 %v4073_v14  ;;  %v1588_v32 = vmax.f32 %v1580_v31, 0.0 }
 0x74b   :  { %v4268_v33 = vpop.eup %4267  ;;  %4076 = vmatpush3.bf16.msra.mxu1 %v4073_v14  ;;  %v1591_v44 = vmax.f32 %v1583_v16, 0.0  ;;  %v4367_v16 = vmov 0.0|0.0  }
 0x74c   :  { %v4077_v39 = vpack.c.bf16 %v1589_v25, %v1588_v32  ;;  %v1582_v19 = vmul.f32 %v4268_v33, %v4900_v46  ;;  %v1599_v46 = vld [vmem:[%s5352_s4 + $0x108] sm:$0xff]  ;;  %4101 = vmatprep.subr.bf16.mxu0 %v4367_v16  ;;  %v5023_v33 = vshrl.u32 %v36_v34, 7 }
 0x74d   :  { %v4089_v48 = vpack.c.bf16 %v1599_v46, %v1598_v36 }
 0x74e   :  { %4078 = vmatprep.subr.bf16.mxu1 %v4077_v39  ;;  %v1590_v24 = vmax.f32 %v1582_v19, 0.0  ;;  %v5033_v19 = vadd.s32 8, %v5023_v33  ;;  %v571_v34 = vadd.s32 16, %v5023_v33  ;;  %v572_v41 = vadd.s32 24, %v5023_v33 }
 0x74f   :  { %4080 = vmatpush3.bf16.msra.mxu1 %v4077_v39  ;;  %v5025_v39 = vstv %s34_s7  ;;  %v575_v46 = vadd.s32 48, %v5023_v33  ;;  %v576_v50 = vadd.s32 56, %v5023_v33 }
 0x750   :  { %v4081_v43 = vpack.c.bf16 %v1591_v44, %v1590_v24  ;;  %vm579_vm13 = vcmp.lt.s32.totalorder %v5023_v33, %v5025_v39  ;;  %vm580_vm15 = vcmp.lt.s32.totalorder %v5033_v19, %v5025_v39  ;;  %vm581_vm1 = vcmp.lt.s32.totalorder %v571_v34, %v5025_v39 }
 0x751   :  { %vm587_vm14 = vmand %vm577_vm12, %vm579_vm13  ;;  %vm582_vm3 = vcmp.lt.s32.totalorder %v572_v41, %v5025_v39  ;;  %v2139_v41 = vstv %s5027_s1 }
 0x752   :  { %4082 = vmatprep.subr.bf16.mxu1 %v4081_v43  ;;  %v5041_v26 = vsel %vm587_vm14, 1.0, %v4366_v38  ;;  %vm588_vm0 = vmand %vm577_vm12, %vm580_vm15 }
 0x753   :  { %4084 = vmatpush3.bf16.msra.mxu1 %v4081_v43  ;;  %v605_v43 = vstv %s604_s8  ;;  %vm589_vm2 = vmand %vm577_vm12, %vm581_vm1 }
 0x754   :  { %4086 = vmatprep.subr.bf16.mxu1 %v4085_v47  ;;  %v5061_v36 = vsel %vm589_vm2, 1.0, %v4366_v38  ;;  %vm590_vm7 = vmand %vm577_vm12, %vm582_vm3  ;;  %vm585_vm3 = vcmp.lt.s32.totalorder %v575_v46, %v5025_v39 }
 0x755   :  { %v5079_v49 = vsel %vm590_vm7, 1.0, %v4366_v38  ;;  %vm593_vm7 = vmand %vm577_vm12, %vm585_vm3 }
 0x756   :  { %3803 = vmatmul.mubr.msk.f32.vlgmr.msra.gmra.mrb[20].mxu1 %vm671_vm8, %v4666_v22  ;;  %v1594_v22 = vld [vmem:[%s5352_s4 + $0xe0] sm:$0xff] }
 0x757   :  { %3805 = vmatprep.mubr.msk.f32.mxu1 %vm671_vm8, %v4673_v28  ;;  %4088 = vmatpush3.bf16.msra.mxu1 %v4085_v47  ;;  %v1595_v28 = vld [vmem:[%s5352_s4 + $0xe8] sm:$0xff]  ;;  %v574_v47 = vadd.s32 40, %v5023_v33 }
 0x758   :  { %4090 = vmatprep.subr.bf16.mxu1 %v4089_v48 }
 0x759   :  { %vm611_vm14 = vcmp.lt.s32.totalorder %v574_v47, %v605_v43 }
 0x75a   :  { %3806 = vmatmul.mubr.msk.f32.gmra.mrb[22].mxu1 %vm671_vm8, %v4676_v30  ;;  %v4097_v30 = vpack.c.bf16 %v1595_v28, %v1594_v22  ;;  %vm627_vm1 = vmand %vm595_vm5, %vm611_vm14  ;;  %vm613_vm14 = vcmp.lt.s32.totalorder %v576_v50, %v605_v43 }
 0x75b   :  { %3808 = vmatprep.mubr.msk.f32.mxu1 %vm671_vm8, %v4693_v40  ;;  %4092 = vmatpush3.bf16.msra.mxu1 %v4089_v48 }
 0x75c   :  { %4094 = vmatprep.subr.bf16.mxu1 %v4093_v51 }
 0x75e   :  { %3809 = vmatmul.mubr.msk.f32.gmra.mrb[24].mxu1 %vm671_vm8, %v4698_v37 }
 0x75f   :  { %3811 = vmatprep.mubr.msk.f32.mxu1 %vm671_vm8, %v4708_v42 }
 0x762   :  { %3812 = vmatmul.mubr.msk.f32.gmra.mrb[26].mxu1 %vm671_vm8, %v4711_v45 }
 0x763   :  { %3822 = vmatprep.mubr.msk.f32.mxu1 %vm801_vm9, %v1584_v9 }
 0x766   :  { %3823 = vmatmul.mubr.msk.f32.vlgmr.msra.gmra.mrb[28].mxu1 %vm801_vm9, %v1585_v12 }
 0x767   :  { %3825 = vmatprep.mubr.msk.f32.mxu1 %vm801_vm9, %v1586_v21  ;;  %4096 = vmatpush3.bf16.msra.mxu1 %v4093_v51 }
 0x768   :  { %4098 = vmatprep.subr.bf16.mxu1 %v4097_v30 }
 0x76a   :  { %3826 = vmatmul.mubr.msk.f32.gmra.mrb[30].mxu1 %vm801_vm9, %v1587_v10 }
 0x76b   :  { %3828 = vmatprep.mubr.msk.f32.mxu1 %vm801_vm9, %v1588_v32  ;;  %4100 = vmatpush3.bf16.msra.mxu1 %v4097_v30 }
 0x76c   :  { %4116 = vmatprep.subr.bf16.mxu1 %v4367_v16 }
 0x76e   :  { %3829 = vmatmul.mubr.msk.f32.gmra.mrb[32].mxu1 %vm801_vm9, %v1589_v25 }
 0x76f   :  { %3831 = vmatprep.mubr.msk.f32.mxu1 %vm801_vm9, %v1590_v24  ;;  %v573_v24 = vadd.s32 32, %v5023_v33 }
 0x771   :  { %vm583_vm4 = vcmp.lt.s32.totalorder %v573_v24, %v5025_v39  ;;  %vm610_vm6 = vcmp.lt.s32.totalorder %v573_v24, %v605_v43 }
 0x772   :  { %3832 = vmatmul.mubr.msk.f32.gmra.mrb[34].mxu1 %vm801_vm9, %v1591_v44  ;;  %v5051_v44 = vsel %vm588_vm0, 1.0, %v4366_v38  ;;  %vm591_vm13 = vmand %vm577_vm12, %vm583_vm4  ;;  %vm612_vm4 = vcmp.lt.s32.totalorder %v575_v46, %v605_v43 }
 0x773   :  { %vm626_vm15 = vmand %vm595_vm5, %vm610_vm6 }
 0x774   :  { %vm634_vm2 = vmor %vm591_vm13, %vm626_vm15  ;;  %vm586_vm13 = vcmp.lt.s32.totalorder %v576_v50, %v5025_v39 }
 0x775   :  { %v5089_v51 = vsel %vm634_vm2, 1.0, %v4366_v38 }
 0x829   :  { %v3804_v40 = vpop.f32.mrb[20].mxu1 }
 0x82a   :  { %v1667_v37 = vpop.f32.mrb[21].mxu1 }
 0x82b   :  { %3842 = vmatprep.mubr.msk.f32.mxu1 %vm801_vm9, %v1667_v37 }
 0x82c   :  { %3843 = vmatmul.mubr.msk.f32.vlgmr.msra.gmra.mrb[28].mxu1 %vm801_vm9, %v3804_v40 }
 0x82d   :  { %v3807_v42 = vpop.f32.mrb[22].mxu1 }
 0x82e   :  { %v1677_v45 = vpop.f32.mrb[23].mxu1 }
 0x82f   :  { %3845 = vmatprep.mubr.msk.f32.mxu1 %vm801_vm9, %v1677_v45 }
 0x830   :  { %3846 = vmatmul.mubr.msk.f32.gmra.mrb[30].mxu1 %vm801_vm9, %v3807_v42 }
 0x831   :  { %v3810_v52 = vpop.f32.mrb[24].mxu1 }
 0x832   :  { %v1687_v53 = vpop.f32.mrb[25].mxu1 }
 0x833   :  { %3848 = vmatprep.mubr.msk.f32.mxu1 %vm801_vm9, %v1687_v53 }
 0x834   :  { %3849 = vmatmul.mubr.msk.f32.gmra.mrb[32].mxu1 %vm801_vm9, %v3810_v52 }
 0x835   :  { %v3813_v54 = vpop.f32.mrb[26].mxu1 }
 0x836   :  { %v1697_v55 = vpop.f32.mrb[27].mxu1 }
 0x837   :  { %3851 = vmatprep.mubr.msk.f32.mxu1 %vm801_vm9, %v1697_v55 }
 0x838   :  { %3852 = vmatmul.mubr.msk.f32.gmra.mrb[34].mxu1 %vm801_vm9, %v3813_v54  ;;  %vm584_vm9 = vcmp.lt.s32.totalorder %v574_v47, %v5025_v39 }
 0x839   :  { %3910 = vmatprep.mubr.msk.f32.mxu1 %vm4368_vm11, %v4366_v38  ;;  %vm5074_vm0 = vmand %vm577_vm12, %vm584_vm9 }
 0x83a   :  { %vm635_vm6 = vmor %vm5074_vm0, %vm627_vm1 }
 0x83b   :  { %vm628_vm9 = vmand %vm595_vm5, %vm612_vm4  ;;  %v5098_v22 = vsel %vm635_vm6, 1.0, %v4366_v38 }
 0x83c   :  { %vm636_vm15 = vmor %vm593_vm7, %vm628_vm9 }
 0x83d   :  { %vm594_vm0 = vmand %vm577_vm12, %vm586_vm13  ;;  %v5106_v28 = vsel %vm636_vm15, 1.0, %v4366_v38  ;;  %vm2138_vm12 = vcmp.eq.s32.totalorder %v5023_v33, 0 }
 0x83e   :  { %vm629_vm1 = vmand %vm595_vm5, %vm613_vm14  ;;  %v2140_v24 = vsel %vm2138_vm12, %v5025_v39, %v2139_v41 }
 0x83f   :  { %vm637_vm2 = vmor %vm594_vm0, %vm629_vm1  ;;  %v2141_v43 = vcvt.s32.f32 %v2140_v24 }
 0x840   :  { %v5110_v30 = vsel %vm637_vm2, 1.0, %v4366_v38 }
 0x8ff   :  { %v3844_v57 = vpop.f32.mrb[28].mxu1 }
 0x900   :  { %v4976_v58 = vadd.f32 %v3844_v57, %v3249_v56  ;;  %v1925_v60 = vpop.f32.mrb[29].mxu1 }
 0x901   :  { %v4978_v61 = vadd.f32 %v3249_v56, %v1925_v60 }
 0x902   :  { %v1977_v62 = vmul.f32 %v4976_v58, %v4976_v58 }
 0x903   :  { %v3847_v63 = vpop.f32.mrb[30].mxu1  ;;  %v1976_v59 = vmul.f32 %v4978_v61, %v4978_v61 }
 0x904   :  { %v4984_v0 = vadd.f32 %v3847_v63, %v3249_v56  ;;  %v1935_v1 = vpop.f32.mrb[31].mxu1  ;;  %v1988_v4 = vsel %vm1984_vm10, %v1977_v62, 0.0 }
 0x905   :  { %v4987_v5 = vadd.f32 %v3249_v56, %v1935_v1  ;;  %1989 = vadd.xlane.f32.xlu0 %v1988_v4  ;;  %v1985_v6 = vsel %vm1984_vm10, %v1976_v59, 0.0 }
 0x906   :  { %1986 = vadd.xlane.f32.xlu1 %v1985_v6  ;;  %v1979_v7 = vmul.f32 %v4984_v0, %v4984_v0 }
 0x907   :  { %v3850_v2 = vpop.f32.mrb[32].mxu1  ;;  %v1978_v8 = vmul.f32 %v4987_v5, %v4987_v5 }
 0x908   :  { %v4994_v3 = vadd.f32 %v3850_v2, %v3249_v56  ;;  %v1945_v9 = vpop.f32.mrb[33].mxu1  ;;  %v1994_v12 = vsel %vm1984_vm10, %v1979_v7, 0.0 }
 0x909   :  { %v4997_v15 = vadd.f32 %v3249_v56, %v1945_v9  ;;  %1995 = vadd.xlane.f32.xlu0 %v1994_v12  ;;  %v1991_v11 = vsel %vm1984_vm10, %v1978_v8, 0.0 }
 0x90a   :  { %1992 = vadd.xlane.f32.xlu1 %v1991_v11  ;;  %v1981_v13 = vmul.f32 %v4994_v3, %v4994_v3 }
 0x90b   :  { %v3853_v17 = vpop.f32.mrb[34].mxu1  ;;  %v1980_v18 = vmul.f32 %v4997_v15, %v4997_v15 }
 0x90c   :  { %v5004_v21 = vadd.f32 %v3853_v17, %v3249_v56  ;;  %v1955_v10 = vpop.f32.mrb[35].mxu1  ;;  %v2000_v23 = vsel %vm1984_vm10, %v1981_v13, 0.0 }
 0x90d   :  { %v5007_v27 = vadd.f32 %v3249_v56, %v1955_v10  ;;  %2001 = vadd.xlane.f32.xlu0 %v2000_v23  ;;  %v1997_v29 = vsel %vm1984_vm10, %v1980_v18, 0.0 }
 0x90e   :  { %1998 = vadd.xlane.f32.xlu1 %v1997_v29  ;;  %v1983_v14 = vmul.f32 %v5004_v21, %v5004_v21 }
 0x90f   :  { %v1982_v31 = vmul.f32 %v5007_v27, %v5007_v27 }
 0x910   :  { %v2006_v32 = vsel %vm1984_vm10, %v1983_v14, 0.0 }
 0x911   :  { %2007 = vadd.xlane.f32.xlu0 %v2006_v32  ;;  %v2003_v25 = vsel %vm1984_vm10, %v1982_v31, 0.0 }
 0x912   :  { %2004 = vadd.xlane.f32.xlu1 %v2003_v25 }
 0x945   :  { %2033 = vxpose.xlu1.b32.start [1/8] (short) (narrow) %v5041_v26, 8 }
 0x949   :  { %2034 = vxpose.xlu1.b32.cont [2/8] (short) (narrow) %v5051_v44, 8 }
 0x94d   :  { %2035 = vxpose.xlu1.b32.cont [3/8] (short) (narrow) %v5061_v36, 8 }
 0x951   :  { %2036 = vxpose.xlu1.b32.cont [4/8] (short) (narrow) %v5079_v49, 8 }
 0x955   :  { %2037 = vxpose.xlu1.b32.cont [5/8] (short) (narrow) %v5089_v51, 8 }
 0x959   :  { %2038 = vxpose.xlu1.b32.cont [6/8] (short) (narrow) %v5098_v22, 8 }
 0x95d   :  { %2039 = vxpose.xlu1.b32.cont [7/8] (short) (narrow) %v5106_v28, 8 }
 0x961   :  { %2040 = vxpose.xlu1.b32.end [8/8] (short) (narrow) %v5110_v30, 8 }
 0x992   :  { %v1990_v40 = vpop.xlane.xlu0 %1989 }
 0x993   :  { %v2010_v37 = vmax.f32 %v1990_v40, 1e-24  ;;  %v1987_v42 = vpop.xlane.xlu1 %1986 }
 0x994   :  { %v2009_v45 = vmax.f32 %v1987_v42, 1e-24 }
 0x995   :  { %4269 = vrsqrt.f32 %v2010_v37 }
 0x996   :  { %4271 = vrsqrt.f32 %v2009_v45  ;;  %v1996_v52 = vpop.xlane.xlu0 %1995 }
 0x997   :  { %v2012_v53 = vmax.f32 %v1996_v52, 1e-24  ;;  %v1993_v54 = vpop.xlane.xlu1 %1992 }
 0x998   :  { %v2011_v55 = vmax.f32 %v1993_v54, 1e-24 }
 0x999   :  { %4273 = vrsqrt.f32 %v2012_v53 }
 0x99a   :  { %4275 = vrsqrt.f32 %v2011_v55  ;;  %v2002_v56 = vpop.xlane.xlu0 %2001 }
 0x99b   :  { %v2014_v57 = vmax.f32 %v2002_v56, 1e-24  ;;  %v1999_v60 = vpop.xlane.xlu1 %1998 }
 0x99c   :  { %v2013_v62 = vmax.f32 %v1999_v60, 1e-24 }
 0x99d   :  { %4277 = vrsqrt.f32 %v2014_v57 }
 0x99e   :  { %4279 = vrsqrt.f32 %v2013_v62  ;;  %v2008_v63 = vpop.xlane.xlu0 %2007 }
 0x99f   :  { %v4270_v59 = vpop.eup %4269  ;;  %v2016_v1 = vmax.f32 %v2008_v63, 1e-24  ;;  %v2005_v4 = vpop.xlane.xlu1 %2004 }
 0x9a0   :  { %v4272_v6 = vpop.eup %4271  ;;  %v2015_v7 = vmax.f32 %v2005_v4, 1e-24  ;;  %v2026_v2 = vmul.f32 %v4270_v59, %v4976_v58 }
 0x9a1   :  { %4281 = vrsqrt.f32 %v2016_v1  ;;  %v2025_v8 = vmul.f32 %v4272_v6, %v4978_v61 }
 0x9a2   :  { %4283 = vrsqrt.f32 %v2015_v7 }
 0x9a3   :  { %v4274_v9 = vpop.eup %4273  ;;  %v4102_v12 = vpack.c.bf16 %v2026_v2, %v2025_v8  ;;  %4285 = vrcp.f32 %v2141_v43 }
 0x9a4   :  { %v4276_v11 = vpop.eup %4275  ;;  %v2028_v13 = vmul.f32 %v4274_v9, %v4984_v0 }
 0x9a5   :  { %4103 = vmatpush3.bf16.msra.mxu0 %v4102_v12  ;;  %4118 = vmatpush3.bf16.msra.mxu1 %v4102_v12  ;;  %v2027_v17 = vmul.f32 %v4276_v11, %v4987_v5 }
 0x9a6   :  { %4104 = vmatprep.subr.bf16.mxu0 %v4367_v16  ;;  %4119 = vmatprep.subr.bf16.mxu1 %v4367_v16 }
 0x9a7   :  { %v4278_v18 = vpop.eup %4277  ;;  %v4105_v10 = vpack.c.bf16 %v2028_v13, %v2027_v17 }
 0x9a8   :  { %v4280_v58 = vpop.eup %4279  ;;  %v2030_v23 = vmul.f32 %v4278_v18, %v4994_v3 }
 0x9a9   :  { %4106 = vmatpush3.bf16.msra.mxu0 %v4105_v10  ;;  %4121 = vmatpush3.bf16.msra.mxu1 %v4105_v10  ;;  %v2029_v61 = vmul.f32 %v4280_v58, %v4997_v15  ;;  %v2144_v15 = vld [vmem:[%s5352_s4 + $0x118] sm:$0xff] }
 0x9aa   :  { %4107 = vmatprep.subr.bf16.mxu0 %v4367_v16  ;;  %4122 = vmatprep.subr.bf16.mxu1 %v4367_v16 }
 0x9ab   :  { %v4282_v0 = vpop.eup %4281  ;;  %v4108_v29 = vpack.c.bf16 %v2030_v23, %v2029_v61 }
 0x9ac   :  { %v4284_v5 = vpop.eup %4283  ;;  %v2032_v14 = vmul.f32 %v4282_v0, %v5004_v21  ;;  %v2145_v21 = vld [vmem:[%s5352_s4 + $0x120] sm:$0xff] }
 0x9ad   :  { %4109 = vmatpush3.bf16.msra.mxu0 %v4108_v29  ;;  %4124 = vmatpush3.bf16.msra.mxu1 %v4108_v29  ;;  %v2031_v31 = vmul.f32 %v4284_v5, %v5007_v27  ;;  %v4114_v32 = vpack.c.bf16 %v2145_v21, %v2144_v15  ;;  %v4286_v47 = vpop.eup %4285  ;;  %v2514_v29 = vadd.s32 128, %v4516_v35  ;;  %v2517_v5 = vand.u32 15, %v4516_v35  ;;  %v2704_v21 = vld [vmem:[%s5352_s4 + $0x180] sm:$0xff] }
 0x9ae   :  { %4110 = vmatprep.subr.bf16.mxu0 %v4367_v16  ;;  %4125 = vmatprep.subr.bf16.mxu1 %v4367_v16 }
 0x9af   :  { %v4111_v3 = vpack.c.bf16 %v2032_v14, %v2031_v31  ;;  %v2518_v15 = vand.u32 15, %v2514_v29  ;;  %vm5157_vm5 = vcmp.eq.s32.totalorder %v2517_v5, %v5023_v33  ;;  %vm5162_vm3 = vcmp.eq.s32.totalorder %v2517_v5, %v5033_v19  ;;  %v2719_v5 = vld [vmem:[%s5352_s4 + $0x1f8] sm:$0xff] }
 0x9b0   :  { %vm4134_vm7 = vmpackc.low %vm5162_vm3, %vm5157_vm5 }
 0x9b1   :  { %4112 = vmatpush3.bf16.msra.mxu0 %v4111_v3  ;;  %4127 = vmatpush3.bf16.msra.mxu1 %v4111_v3  ;;  %vm2532_vm4 = vcmp.eq.s32.totalorder %v2518_v15, %v5023_v33  ;;  %vm2534_vm6 = vcmp.eq.s32.totalorder %v2518_v15, %v5033_v19  ;;  %v2703_v15 = vld [vmem:[%s5352_s4 + $0x178] sm:$0xff] }
 0x9b2   :  { %4113 = vmatprep.subr.bf16.mxu0 %v4367_v16  ;;  %vm4132_vm13 = vmpackc.low %vm2534_vm6, %vm2532_vm4 }
 0x9c5   :  { %v2049_v27 = vpop.trf.xlu1 }
 0x9c6   :  { %3871 = vmatmul.mubr.msk.f32.vlgmr.msra.gmra.mrb[36].mxu0 %vm671_vm8, %v2049_v27 }
 0x9c7   :  { %4115 = vmatpush3.bf16.msra.mxu0 %v4114_v32  ;;  %3877 = vmatprep.mubr.msk.f32.mxu0 %vm4368_vm11, %v4366_v38  ;;  %v2516_v32 = vshra.s32 %v2514_v29, 4  ;;  %v2702_v29 = vld [vmem:[%s5352_s4 + $0x170] sm:$0xff] }
 0x9c9   :  { %vm2520_vm9 = vcmp.eq.s32.totalorder %v2516_v32, %v5023_v33  ;;  %vm2522_vm14 = vcmp.eq.s32.totalorder %v2516_v32, %v5033_v19  ;;  %v2722_v32 = vld [vmem:[%s5352_s4 + $0x210] sm:$0xff] }
 0x9ca   :  { %vm4128_vm15 = vmpackc.low %vm2522_vm14, %vm2520_vm9 }
 0x9cb   :  { %4129 = vmatprep.subr.msk.bf16.mxu1 %vm4128_vm15, %v4365_v20 }
 0xa99   :  { %v2134_v25 = vpop.f32.mrb[36].mxu0 }
 0xa9a   :  { %v3872_v34 = vpop.f32.mrb[37].mxu0  ;;  %3878 = vmatmul.mubr.msk.f32.vlgmr.msra.gmra.mrb[38].mxu0 %vm1984_vm10, %v2134_v25 }
 0xa9b   :  { %3882 = vmatprep.mubr.msk.f32.mxu0 %vm1984_vm10, %v2025_v8 }
 0xb6d   :  { %v2215_v46 = vpop.f32.mrb[38].mxu0 }
 0xb6e   :  { %v2219_v48 = vmul.f32 %v4286_v47, %v2215_v46  ;;  %v3879_v50 = vpop.f32.mrb[39].mxu0 }
 0xb70   :  { %4287 = vtanh.f32 %v2219_v48 }
 0xb7a   :  { %v4288_v40 = vpop.eup %4287 }
 0xb7b   :  { %3880 = vmatprep.subr.msk.mxu0 %vm1984_vm10, %v4288_v40 }
 0xb7c   :  { %3881 = vmatpush3.xpose.msk.msra.mxu0 %vm1984_vm10, %v4288_v40 }
 0xb7d   :  { %4133 = vmatprep.subr.msk.bf16.mxu0 %vm4132_vm13, %v4365_v20 }
 0xb7f   :  { %3883 = vmatmul.mubr.msk.f32.vlgmr.msra.gmra.mrb[40].mxu0 %vm1984_vm10, %v2026_v2 }
 0xb80   :  { %3885 = vmatprep.mubr.msk.f32.mxu0 %vm1984_vm10, %v2027_v17  ;;  %4135 = vmatpush1.bf16.msk.msra.mxu0 %vm4134_vm7, %v4365_v20 }
 0xb81   :  { %4139 = vmatprep.subr.bf16.mxu0 %v4367_v16 }
 0xb83   :  { %3886 = vmatmul.mubr.msk.f32.gmra.mrb[42].mxu0 %vm1984_vm10, %v2028_v13 }
 0xb84   :  { %3888 = vmatprep.mubr.msk.f32.mxu0 %vm1984_vm10, %v2029_v61 }
 0xb87   :  { %3889 = vmatmul.mubr.msk.f32.gmra.mrb[44].mxu0 %vm1984_vm10, %v2030_v23 }
 0xb88   :  { %3891 = vmatprep.mubr.msk.f32.mxu0 %vm1984_vm10, %v2031_v31 }
 0xb8b   :  { %3892 = vmatmul.mubr.msk.f32.gmra.mrb[46].mxu0 %vm1984_vm10, %v2032_v14 }
 0xb8c   :  { %2684 = vmatprep.mubr.f32.mxu0 %v4366_v38 }
 0xc52   :  { %v3884_v39 = vpop.f32.mrb[40].mxu0 }
 0xc53   :  { %v3262_v37 = vmul.f32 -1.442695, %v3884_v39  ;;  %v2314_v42 = vpop.f32.mrb[41].mxu0 }
 0xc54   :  { %v3261_v45 = vmul.f32 -1.442695, %v2314_v42  ;;  %v2693_v42 = vld [vmem:[%s5352_s4 + $0x128] sm:$0xff] }
 0xc55   :  { %4289 = vpow2.f32 %v3262_v37 }
 0xc56   :  { %4291 = vpow2.f32 %v3261_v45  ;;  %v3887_v52 = vpop.f32.mrb[42].mxu0  ;;  %v2694_v45 = vld [vmem:[%s5352_s4 + $0x130] sm:$0xff] }
 0xc57   :  { %v2324_v53 = vpop.f32.mrb[43].mxu0  ;;  %v3264_v54 = vmul.f32 -1.442695, %v3887_v52 }
 0xc58   :  { %v3263_v55 = vmul.f32 -1.442695, %v2324_v53 }
 0xc5a   :  { %4293 = vpow2.f32 %v3263_v55  ;;  %v3890_v56 = vpop.f32.mrb[44].mxu0  ;;  %v2712_v55 = vld [vmem:[%s5352_s4 + $0x1c0] sm:$0xff] }
 0xc5b   :  { %v2334_v57 = vpop.f32.mrb[45].mxu0  ;;  %4295 = vpow2.f32 %v3264_v54  ;;  %v3266_v62 = vmul.f32 -1.442695, %v3890_v56  ;;  %v2711_v54 = vld [vmem:[%s5352_s4 + $0x1b8] sm:$0xff] }
 0xc5c   :  { %v3265_v60 = vmul.f32 -1.442695, %v2334_v57 }
 0xc5e   :  { %v3893_v63 = vpop.f32.mrb[46].mxu0  ;;  %4297 = vpow2.f32 %v3265_v60  ;;  %v4144_v60 = vpack.c.bf16 %v2694_v45, %v2693_v42 }
 0xc5f   :  { %v4290_v59 = vpop.eup %4289  ;;  %v2344_v1 = vpop.f32.mrb[47].mxu0  ;;  %4299 = vpow2.f32 %v3266_v62  ;;  %v3268_v11 = vmul.f32 -1.442695, %v3893_v63  ;;  %v4146_v62 = vpack.c.bf16 %v2712_v55, %v2711_v54  ;;  %v2695_v63 = vld [vmem:[%s5352_s4 + $0x138] sm:$0xff]  ;;  %v2939_v54 = vld [vmem:[%s5352_s4 + $0x248] sm:$0x1] }
 0xc60   :  { %v4292_v4 = vpop.eup %4291  ;;  %v2378_v6 = vadd.f32 1.0, %v4290_v59  ;;  %v3267_v8 = vmul.f32 -1.442695, %v2344_v1  ;;  %v2696_v59 = vld [vmem:[%s5352_s4 + $0x140] sm:$0xff]  ;;  %v2713_v1 = vld [vmem:[%s5352_s4 + $0x1c8] sm:$0xff] }
 0xc61   :  { %v2377_v7 = vadd.f32 1.0, %v4292_v4  ;;  %v2714_v4 = vld [vmem:[%s5352_s4 + $0x1d0] sm:$0xff] }
 0xc63   :  { %4301 = vrcp.f32 %v2377_v7  ;;  %v4150_v7 = vpack.c.bf16 %v2714_v4, %v2713_v1 }
 0xc64   :  { %v4294_v2 = vpop.eup %4293  ;;  %4303 = vrcp.f32 %v2378_v6  ;;  %v4148_v6 = vpack.c.bf16 %v2696_v59, %v2695_v63  ;;  %v2944_v63 = vld [vmem:[%s5352_s4 + $0x260] sm:$0x1] }
 0xc65   :  { %v2379_v9 = vadd.f32 1.0, %v4294_v2  ;;  %v4296_v12 = vpop.eup %4295  ;;  %4305 = vpow2.f32 %v3267_v8  ;;  %v2697_v2 = vld [vmem:[%s5352_s4 + $0x148] sm:$0xff]  ;;  %v2698_v8 = vld [vmem:[%s5352_s4 + $0x150] sm:$0xff] }
 0xc66   :  { %v2380_v13 = vadd.f32 1.0, %v4296_v12  ;;  %v2716_v12 = vld [vmem:[%s5352_s4 + $0x1e0] sm:$0xff] }
 0xc67   :  { %4307 = vrcp.f32 %v2379_v9  ;;  %v2715_v9 = vld [vmem:[%s5352_s4 + $0x1d8] sm:$0xff] }
 0xc68   :  { %v4298_v17 = vpop.eup %4297  ;;  %4309 = vpow2.f32 %v3268_v11  ;;  %v4152_v11 = vpack.c.bf16 %v2698_v8, %v2697_v2 }
 0xc69   :  { %v4300_v18 = vpop.eup %4299  ;;  %4311 = vrcp.f32 %v2380_v13  ;;  %v2381_v58 = vadd.f32 1.0, %v4298_v17  ;;  %v4154_v13 = vpack.c.bf16 %v2716_v12, %v2715_v9  ;;  %v2699_v17 = vld [vmem:[%s5352_s4 + $0x158] sm:$0xff] }
 0xc6a   :  { %v2382_v0 = vadd.f32 1.0, %v4300_v18  ;;  %v2700_v18 = vld [vmem:[%s5352_s4 + $0x160] sm:$0xff] }
 0xc6b   :  { %4313 = vrcp.f32 %v2381_v58  ;;  %v2718_v58 = vld [vmem:[%s5352_s4 + $0x1f0] sm:$0xff] }
 0xc6c   :  { %4315 = vrcp.f32 %v2382_v0  ;;  %v2701_v0 = vld [vmem:[%s5352_s4 + $0x168] sm:$0xff] }
 0xc6d   :  { %v4302_v10 = vpop.eup %4301 }
 0xc6e   :  { %v2401_v23 = vmul.f32 %v4302_v10, %v5041_v26  ;;  %v4304_v61 = vpop.eup %4303  ;;  %v2717_v10 = vld [vmem:[%s5352_s4 + $0x1e8] sm:$0xff] }
 0xc6f   :  { %v4306_v14 = vpop.eup %4305  ;;  %v2402_v31 = vmul.f32 %v4304_v61, %v5051_v44  ;;  %v4158_v61 = vpack.c.bf16 %v2718_v58, %v2717_v10  ;;  %v2721_v26 = vld [vmem:[%s5352_s4 + $0x208] sm:$0xff] }
 0xc70   :  { %2409 = vxpose.xlu0.b32.start [1/8] (short) (narrow) %v2401_v23, 8  ;;  %v2383_v27 = vadd.f32 1.0, %v4306_v14  ;;  %v4156_v23 = vpack.c.bf16 %v2700_v18, %v2699_v17  ;;  %v2720_v14 = vld [vmem:[%s5352_s4 + $0x200] sm:$0xff] }
 0xc71   :  { %v4308_v3 = vpop.eup %4307 }
 0xc72   :  { %v4310_v44 = vpop.eup %4309  ;;  %v2403_v25 = vmul.f32 %v4308_v3, %v5061_v36  ;;  %4317 = vrcp.f32 %v2383_v27  ;;  %v4162_v3 = vpack.c.bf16 %v2720_v14, %v2719_v5  ;;  %v4164_v27 = vpack.c.bf16 %v2704_v21, %v2703_v15 }
 0xc73   :  { %v4312_v34 = vpop.eup %4311  ;;  %v2384_v41 = vadd.f32 1.0, %v4310_v44  ;;  %v4166_v44 = vpack.c.bf16 %v2722_v32, %v2721_v26 }
 0xc74   :  { %2410 = vxpose.xlu0.b32.cont [2/8] (short) (narrow) %v2402_v31, 8  ;;  %v2404_v24 = vmul.f32 %v4312_v34, %v5079_v49  ;;  %v2515_v49 = vshra.s32 %v4516_v35, 4  ;;  %v2728_v35 = vld [vmem:[%s5352_s4 + $0x240] sm:$0xff]  ;;  %v4160_v31 = vpack.c.bf16 %v2702_v29, %v2701_v0  ;;  %v2706_v34 = vld [vmem:[%s5352_s4 + $0x190] sm:$0xff] }
 0xc75   :  { %v4314_v43 = vpop.eup %4313  ;;  %4319 = vrcp.f32 %v2384_v41 }
 0xc76   :  { %v4316_v36 = vpop.eup %4315  ;;  %v2405_v47 = vmul.f32 %v4314_v43, %v5089_v51  ;;  %vm2519_vm0 = vcmp.eq.s32.totalorder %v2515_v49, %v5023_v33  ;;  %vm2521_vm1 = vcmp.eq.s32.totalorder %v2515_v49, %v5033_v19  ;;  %v2709_v33 = vld [vmem:[%s5352_s4 + $0x1a8] sm:$0xff]  ;;  %v2724_v43 = vld [vmem:[%s5352_s4 + $0x220] sm:$0xff] }
 0xc77   :  { %v2406_v46 = vmul.f32 %v4316_v36, %v5098_v22  ;;  %vm4130_vm2 = vmpackc.low %vm2521_vm1, %vm2519_vm0  ;;  %v2727_v22 = vld [vmem:[%s5352_s4 + $0x238] sm:$0xff]  ;;  %v2725_v19 = vld [vmem:[%s5352_s4 + $0x228] sm:$0xff] }
 0xc78   :  { %2411 = vxpose.xlu0.b32.cont [3/8] (short) (narrow) %v2403_v25, 8  ;;  %v2705_v25 = vld [vmem:[%s5352_s4 + $0x188] sm:$0xff] }
 0xc79   :  { %v4168_v41 = vpack.c.bf16 %v2706_v34, %v2705_v25 }
 0xc7c   :  { %2412 = vxpose.xlu0.b32.cont [4/8] (short) (narrow) %v2404_v24, 8  ;;  %v4318_v48 = vpop.eup %4317  ;;  %v2723_v24 = vld [vmem:[%s5352_s4 + $0x218] sm:$0xff] }
 0xc7d   :  { %v2407_v50 = vmul.f32 %v4318_v48, %v5106_v28  ;;  %v2726_v28 = vld [vmem:[%s5352_s4 + $0x230] sm:$0xff]  ;;  %v4170_v36 = vpack.c.bf16 %v2724_v43, %v2723_v24 }
 0xc7e   :  { %v4140_v53 = vpack.c.bf16 %v2726_v28, %v2725_v19 }
 0xc7f   :  { %v4320_v40 = vpop.eup %4319 }
 0xc80   :  { %2413 = vxpose.xlu0.b32.cont [5/8] (short) (narrow) %v2405_v47, 8  ;;  %v2408_v39 = vmul.f32 %v4320_v40, %v5110_v30  ;;  %v4137_v30 = vpack.c.bf16 %v2728_v35, %v2727_v22  ;;  %v2707_v47 = vld [vmem:[%s5352_s4 + $0x198] sm:$0xff] }
 0xc84   :  { %2414 = vxpose.xlu0.b32.cont [6/8] (short) (narrow) %v2406_v46, 8  ;;  %v2708_v46 = vld [vmem:[%s5352_s4 + $0x1a0] sm:$0xff] }
 0xc85   :  { %v4172_v48 = vpack.c.bf16 %v2708_v46, %v2707_v47 }
 0xc88   :  { %2415 = vxpose.xlu0.b32.cont [7/8] (short) (narrow) %v2407_v50, 8 }
 0xc8c   :  { %2416 = vxpose.xlu0.b32.end [8/8] (short) (narrow) %v2408_v39, 8 }
 0xcf0   :  { %v2425_v51 = vpop.trf.xlu0 }
 0xcf1   :  { %3911 = vmatmul.mubr.msk.f32.vlgmr.msra.gmra.mrb[36].mxu1 %vm671_vm8, %v2425_v51  ;;  %vm3101_vm8 = vcmask 0  }
 0xcf2   :  { %4131 = vmatpush1.bf16.msk.msra.mxu1 %vm4130_vm2, %v4365_v20  ;;  %2610 = vmatprep.mubr.f32.mxu1 %v4366_v38  ;;  %v2710_v20 = vld [vmem:[%s5352_s4 + $0x1b0] sm:$0xff] }
 0xcf3   :  { %4136 = vmatprep.subr.bf16.mxu1 %v4367_v16  ;;  %v4142_v37 = vpack.c.bf16 %v2710_v20, %v2709_v33 }
 0xdc4   :  { %v2510_v52 = vpop.f32.mrb[36].mxu1 }
 0xdc5   :  { %v2617_v56 = vrot.slane %v2510_v52, 1  ;;  %v3912_v57 = vpop.f32.mrb[37].mxu1  ;;  %3282 = vmatmul.mubr.msk.f32.vlgmr.msra.gmra.mrb[38].mxu1 %vm1984_vm10, %v2510_v52 }
 0xdc6   :  { %4138 = vmatpush3.bf16.msra.mxu1 %v4137_v30  ;;  %3917 = vmatprep.mubr.msk.f32.mxu1 %vm4368_vm11, %v4366_v38  ;;  %v2942_v30 = vld [vmem:[%s5352_s4 + $0x250] sm:$0xff] }
 0xdc7   :  { %3287 = vmatmul.mubr.msk.f32.vlgmr.msra.gmra.mrb[48].mxu0 %vm1984_vm10, %v2617_v56  ;;  %4143 = vmatprep.subr.bf16.mxu1 %v4142_v37  ;;  %v2943_v37 = vld [vmem:[%s5352_s4 + $0x258] sm:$0xff] }
 0xdc8   :  { %4141 = vmatpush3.bf16.msra.mxu0 %v4140_v53  ;;  %3924 = vmatprep.mubr.msk.f32.mxu0 %vm4368_vm11, %v4366_v38  ;;  %v4175_v42 = vpack.c.bf16 %v2943_v37, %v2942_v30 }
 0xdc9   :  { %3918 = vmatmul.mubr.msk.f32.vlgmr.msra.gmra.mrb[40].mxu1 %vm1984_vm10, %v2617_v56  ;;  %4174 = vmatprep.subr.bf16.mxu0 %v4367_v16 }
 0xdca   :  { %4145 = vmatpush3.bf16.msra.mxu1 %v4144_v60  ;;  %v3019_v60 = vld [vmem:[%s5352_s4 + $0x268] sm:$0xff] }
 0xdcb   :  { %3925 = vmatmul.mubr.msk.f32.vlgmr.msra.gmra.mrb[50].mxu0 %vm1984_vm10, %v2510_v52  ;;  %4147 = vmatprep.subr.bf16.mxu1 %v4146_v62 }
 0xdcc   :  { %3931 = vmatprep.mubr.msk.f32.mxu0 %vm4368_vm11, %v4366_v38  ;;  %4176 = vmatpush3.bf16.msra.mxu0 %v4175_v42 }
 0xdcd   :  { %4177 = vmatprep.subr.bf16.mxu0 %v4367_v16  ;;  %v3020_v16 = vld [vmem:[%s5352_s4 + $0x270] sm:$0xff] }
 0xdce   :  { %4149 = vmatpush3.bf16.msra.mxu1 %v4148_v6  ;;  %v4178_v62 = vpack.c.bf16 %v3020_v16, %v3019_v60 }
 0xdcf   :  { %4151 = vmatprep.subr.bf16.mxu1 %v4150_v7 }
 0xdd2   :  { %4153 = vmatpush3.bf16.msra.mxu1 %v4152_v11 }
 0xdd3   :  { %4155 = vmatprep.subr.bf16.mxu1 %v4154_v13 }
 0xdd6   :  { %4157 = vmatpush3.bf16.msra.mxu1 %v4156_v23 }
 0xdd7   :  { %4159 = vmatprep.subr.bf16.mxu1 %v4158_v61 }
 0xdda   :  { %4161 = vmatpush3.bf16.msra.mxu1 %v4160_v31 }
 0xddb   :  { %4163 = vmatprep.subr.bf16.mxu1 %v4162_v3 }
 0xdde   :  { %4165 = vmatpush3.bf16.msra.mxu1 %v4164_v27 }
 0xddf   :  { %4167 = vmatprep.subr.bf16.mxu1 %v4166_v44 }
 0xde2   :  { %4169 = vmatpush3.bf16.msra.mxu1 %v4168_v41 }
 0xde3   :  { %4171 = vmatprep.subr.bf16.mxu1 %v4170_v36 }
 0xde6   :  { %4173 = vmatpush3.bf16.msra.mxu1 %v4172_v48 }
 0xe98   :  { %v2612_v50 = vpop.f32.mrb[38].mxu1 }
 0xe99   :  { %v2614_v40 = vpop.f32.mrb[39].mxu1 }
 0xe9a   :  { %v2686_v39 = vpop.f32.mrb[48].mxu0 }
 0xe9b   :  { %v2691_v49 = vmul.f32 %v2686_v39, %v2612_v50  ;;  %v2688_v51 = vpop.f32.mrb[49].mxu0 }
 0xe9c   :  { %v2692_v22 = vmul.f32 %v2688_v51, %v2614_v40  ;;  %v2795_v35 = vpop.f32.mrb[40].mxu1 }
 0xe9d   :  { %v3919_v33 = vpop.f32.mrb[41].mxu1 }
 0xe9e   :  { %v2865_v20 = vpop.f32.mrb[50].mxu0  ;;  %2933 = vmatprep.mubr.f32.mxu1 %v2692_v22 }
 0xe9f   :  { %v2866_v19 = vadd.f32 %v2865_v20, %v2795_v35  ;;  %v3926_v28 = vpop.f32.mrb[51].mxu0  ;;  %2934 = vmatmul.mubr.f32.vlgmr.msra.gmra.mrb[42].mxu1 %v2691_v49 }
 0xf72   :  { %v3537_v45 = vpop.f32.mrb[42].mxu1 }
 0xf73   :  { %v3538_v52 = vpop.f32.mrb[43].mxu1 }
 0xf74   :  { %v3539_v53 = vadd.f32 %v3538_v52, %v3537_v45 }
 0xf76   :  { %v2936_v55 = vadd.f32 %v3539_v53, %v2866_v19 }
 0xf78   :  { %v2940_v56 = vadd.f32 %v2939_v54, %v2936_v55 }
 0xf7a   :  { %v2941_v57 = vmax.f32 %v2940_v56, 0.0 }
 0xf7c   :  { %3932 = vmatmul.mubr.msk.f32.vlgmr.msra.gmra.mrb[52].mxu0 %vm1984_vm10, %v2941_v57 }
 0xf7d   :  { %3938 = vmatprep.mubr.msk.f32.mxu0 %vm4368_vm11, %v4366_v38  ;;  %4179 = vmatpush3.bf16.msra.mxu0 %v4178_v62  ;;  %v3021_v38 = vld [vmem:[%s5352_s4 + $0x278] sm:$0x1] }
0x104f   :  { %v3014_v59 = vpop.f32.mrb[52].mxu0 }
0x1050   :  { %v3015_v1 = vadd.f32 %v3014_v59, %v2944_v63  ;;  %v3933_v4 = vpop.f32.mrb[53].mxu0 }
0x1052   :  { %v3018_v6 = vmax.f32 %v3015_v1, 0.0 }
0x1054   :  { %3939 = vmatmul.mubr.msk.f32.vlgmr.msra.gmra.mrb[54].mxu0 %vm1984_vm10, %v3018_v6 }
0x1127   :  { %v3091_v7 = vpop.f32.mrb[54].mxu0 }
0x1128   :  { %v3092_v2 = vadd.f32 %v3091_v7, %v3021_v38  ;;  %v3940_v8 = vpop.f32.mrb[55].mxu0 }
0x112a   :  { %v3292_v9 = vmul.f32 -1.442695, %v3092_v2 }
0x112c   :  { %4321 = vpow2.f32 %v3292_v9 }
0x1136   :  { %v4322_v12 = vpop.eup %4321 }
0x1137   :  { %v3098_v11 = vadd.f32 1.0, %v4322_v12 }
0x1139   :  { %4323 = vrcp.f32 %v3098_v11 }
0x1143   :  { %v4324_v13 = vpop.eup %4323 }
0x1144   :  { %3102 = vst.msk [vmem:[#allocation5] sm:$0x1] %vm3101_vm8, %v4324_v13 }
0x1145   :  { %4348 = shalt.err (!%p4345_p9)
}
0x1146   :  { %s4349_s16 = scalar_lea.hbm %s5353_s5, 16 }
0x1147   :  { %p4350_p10 = scmp.ne.s32.totalorder %s5353_s5, %s4349_s16  ;;  %p4353_p11 = scmp.lt.u32.totalorder %s4349_s16, %s5353_s5 }
0x1149   :  { %p4355_p12 = pnand %p4353_p11, %p4350_p10 }
0x114b   :  { %4358 = shalt.err (!%p4355_p12)
}
0x114c   :  { %3112 = dma.vmem_to_hbm [thread:$0]  %s3110_s12, 16, %s5353_s5, [#allocation3]  }
0x114d   :  { %4361 = dma.done.wait [#allocation3], 16  }
0x114e   :  { %4362 = vsyncadd [#allocation3], 4294967280 }
0x114f   :  { %3116 = vsyncpa [#allocation3], 1 }
0x1150   :  { %3117 = vsyncpa [#allocation4], 1 }

</bundles_post_ra>
